<compile_context>
chip_gen: v7x
topology: tpu7x:2x2x1
jax: 0.10.0
libtpu: 0.0.40
codegen_flags: <defaults>
</compile_context>

<pallas_src>
import functools

import jax
import jax.numpy as jnp
from jax import lax
from jax.experimental import pallas as pl
from jax.experimental.pallas import tpu as pltpu


def _round_up(n, m):
    return ((n + m - 1) // m) * m


def _specaug_kernel(rect_f_ref, rect_t_ref, cutx_ref, cuty_ref,   # scalar prefetch (SMEM, 1D)
                    x_ref, o_ref, *,                              # VMEM tiles: (F, TILE_T)
                    tile_t,
                    n_rect, n_rect_eff, rect_freq, rect_time,
                    n_x, n_x_eff, x_width,
                    n_y, n_y_eff, y_width):
    b = pl.program_id(0)
    t0 = pl.program_id(1) * tile_t                     # global column offset of this tile
    x = x_ref[...]                                     # (F, TILE_T)
    F, TT = x.shape

    # Separable 1D index vectors: VPU compare work is O(F + T), not O(F*T).
    rows = lax.broadcasted_iota(jnp.int32, (F, 1), 0)          # freq index
    cols = lax.broadcasted_iota(jnp.int32, (1, TT), 1) + t0    # global time index

    # SpecAugment "x" regions: full-time frequency stripes (dim 1).
    row_stripe = jnp.zeros((F, 1), dtype=jnp.bool_)
    for r in range(n_x):
        fs = cutx_ref[b * n_x_eff + r]
        row_stripe = row_stripe | ((rows >= fs) & (rows < fs + x_width))

    # SpecAugment "y" regions: full-freq time stripes (dim 2).
    col_stripe = jnp.zeros((1, TT), dtype=jnp.bool_)
    for r in range(n_y):
        ts = cuty_ref[b * n_y_eff + r]
        col_stripe = col_stripe | ((cols >= ts) & (cols < ts + y_width))

    mask = row_stripe | col_stripe                     # broadcasts to (F, TT)

    # SpecCutoutRegions: rectangular freq x time cutouts (per-rect 1D AND).
    for r in range(n_rect):
        fs = rect_f_ref[b * n_rect_eff + r]
        ts = rect_t_ref[b * n_rect_eff + r]
        rp = (rows >= fs) & (rows < fs + rect_freq)    # (F, 1)
        cp = (cols >= ts) & (cols < ts + rect_time)    # (1, TT)
        mask = mask | (rp & cp)

    # masked_fill(mask, 0) with a scalar zero operand.
    o_ref[...] = jnp.where(mask, jnp.zeros((), dtype=x.dtype), x)


def _draw_starts(key, B, F, T, *,
                 cutout_rect_regions, cutout_rect_time, cutout_rect_freq,
                 cutout_x_regions, cutout_x_width,
                 cutout_y_regions, cutout_y_width):
    """int(random.uniform(0, hi)) draws, one set per batch element / region.

    Returned flat (B * n_eff,) int32 arrays, region index fastest-varying.
    """
    k1, k2, k3, k4 = jax.random.split(key, 4)

    def _starts(k, n, hi):
        n_eff = max(n, 1)  # keep the SMEM arrays non-empty even with 0 regions
        # NOTE: max(hi, 1) clamps degenerate configs (region wider than the
        # axis, where the PyTorch module would sample a negative start).
        u = jax.random.uniform(k, (B * n_eff,), minval=0.0, maxval=float(max(hi, 1)))
        return jnp.floor(u).astype(jnp.int32)

    rect_f = _starts(k1, cutout_rect_regions, F - cutout_rect_freq)
    rect_t = _starts(k2, cutout_rect_regions, T - cutout_rect_time)
    cut_x = _starts(k3, cutout_x_regions, F - cutout_x_width)
    cut_y = _starts(k4, cutout_y_regions, T - cutout_y_width)
    return rect_f, rect_t, cut_x, cut_y


_STATIC_CFG = ("cutout_rect_regions", "cutout_rect_time", "cutout_rect_freq",
               "cutout_x_regions", "cutout_x_width",
               "cutout_y_regions", "cutout_y_width")


@functools.partial(jax.jit, static_argnames=_STATIC_CFG)
def spectrogram_augmentation(x, key, *,
                             cutout_rect_regions=2, cutout_rect_time=3, cutout_rect_freq=4,
                             cutout_x_regions=1, cutout_x_width=4,
                             cutout_y_regions=1, cutout_y_width=3):
    """x: [B, F, T] float array. Returns the augmented spectrogram."""
    B, F, T = x.shape
    cfg = dict(cutout_rect_regions=cutout_rect_regions,
               cutout_rect_time=cutout_rect_time, cutout_rect_freq=cutout_rect_freq,
               cutout_x_regions=cutout_x_regions, cutout_x_width=cutout_x_width,
               cutout_y_regions=cutout_y_regions, cutout_y_width=cutout_y_width)
    rect_f, rect_t, cut_x, cut_y = _draw_starts(key, B, F, T, **cfg)

    # Lane-dense time tiling: tile is a multiple of 128 lanes, capped at 1024
    # (>=512-lane tiles sit near the HBM roofline; the double-buffered in+out
    # working set stays far below the scoped-VMEM budget on v5e/v6e/v7x).
    # No padding: grid is ceil-div and Pallas masks the single partial edge
    # tile, which is much cheaper than a full pad+slice HBM round trip.
    LANE = 128
    MAX_TILE_T = 1024
    tile_t = min(_round_up(T, LANE), MAX_TILE_T)
    n_t = pl.cdiv(T, tile_t)

    kernel = functools.partial(
        _specaug_kernel, tile_t=tile_t,
        n_rect=cutout_rect_regions, n_rect_eff=max(cutout_rect_regions, 1),
        rect_freq=cutout_rect_freq, rect_time=cutout_rect_time,
        n_x=cutout_x_regions, n_x_eff=max(cutout_x_regions, 1), x_width=cutout_x_width,
        n_y=cutout_y_regions, n_y_eff=max(cutout_y_regions, 1), y_width=cutout_y_width)

    block = (pl.Squeezed(), F, tile_t)
    out = pl.pallas_call(
        kernel,
        out_shape=jax.ShapeDtypeStruct((B, F, T), x.dtype),
        grid_spec=pltpu.PrefetchScalarGridSpec(
            num_scalar_prefetch=4,
            grid=(B, n_t),
            in_specs=[pl.BlockSpec(block, lambda b, j, *pref: (b, 0, j))],
            out_specs=pl.BlockSpec(block, lambda b, j, *pref: (b, 0, j)),
        ),
        compiler_params=pltpu.CompilerParams(
            dimension_semantics=("parallel", "parallel")),
    )(rect_f, rect_t, cut_x, cut_y, x)
    return out


if __name__ == "__main__":
    key = jax.random.PRNGKey(0)
    k_in, k_aug = jax.random.split(key)

    B, F, T = 2, 64, 1024   # small spectrogram batch
    x = jax.random.normal(k_in, (B, F, T), dtype=jnp.float32)

    cfg = dict(cutout_rect_regions=2, cutout_rect_time=32, cutout_rect_freq=8,
               cutout_x_regions=2, cutout_x_width=6,
               cutout_y_regions=2, cutout_y_width=24)

    out = spectrogram_augmentation(x, k_aug, **cfg)
    out = jax.block_until_ready(out)

    # Pure-JAX reference built from the identical random start indices.
    rect_f, rect_t, cut_x, cut_y = _draw_starts(k_aug, B, F, T, **cfg)
    rect_f = rect_f.reshape(B, -1)
    rect_t = rect_t.reshape(B, -1)
    cut_x = cut_x.reshape(B, -1)
    cut_y = cut_y.reshape(B, -1)
    rows = jnp.arange(F)[None, :, None]
    cols = jnp.arange(T)[None, None, :]
    mask = jnp.zeros((B, F, T), dtype=bool)
    for r in range(cfg["cutout_rect_regions"]):
        fs = rect_f[:, r][:, None, None]
        ts = rect_t[:, r][:, None, None]
        mask |= ((rows >= fs) & (rows < fs + cfg["cutout_rect_freq"]) &
                 (cols >= ts) & (cols < ts + cfg["cutout_rect_time"]))
    for r in range(cfg["cutout_x_regions"]):
        fs = cut_x[:, r][:, None, None]
        mask |= (rows >= fs) & (rows < fs + cfg["cutout_x_width"])
    for r in range(cfg["cutout_y_regions"]):
        ts = cut_y[:, r][:, None, None]
        mask |= (cols >= ts) & (cols < ts + cfg["cutout_y_width"])
    ref = jnp.where(mask, jnp.zeros((), x.dtype), x)

    assert out.shape == x.shape and out.dtype == x.dtype
    assert int(jnp.sum(out == 0.0)) > 0
    assert bool(jnp.array_equal(out, ref))

    print("KERNEL_OK")
</pallas_src>

<mosaic_0001>
module attributes {stable_mosaic.version = 11 : i64} {
  func.func @_specaug_kernel(%arg0: i32, %arg1: i32, %arg2: memref<4xi32, #tpu.memory_space<smem>>, %arg3: memref<4xi32, #tpu.memory_space<smem>>, %arg4: memref<4xi32, #tpu.memory_space<smem>>, %arg5: memref<4xi32, #tpu.memory_space<smem>>, %arg6: memref<1x64x1024xf32, #tpu.memory_space<vmem>>, %arg7: memref<1x64x1024xf32, #tpu.memory_space<vmem>>) attributes {dimension_semantics = [#tpu.dimension_semantics<parallel>, #tpu.dimension_semantics<parallel>], iteration_bounds = array<i64: 2, 1>, scalar_prefetch = 4 : i64, scratch_operands = 0 : i64, tpu.core_type = #tpu.core_type<tc>, window_params = [{transform_indices = @transform_0, window_bounds = array<i64: 1, 64, 1024>}, {transform_indices = @transform_1, window_bounds = array<i64: 1, 64, 1024>}]} {
    %c1024_i32 = arith.constant 1024 : i32
    %0 = arith.muli %arg1, %c1024_i32 : i32
    %c0 = arith.constant 0 : index
    %c0_0 = arith.constant 0 : index
    %c0_1 = arith.constant 0 : index
    %1 = vector.load %arg6[%c0, %c0_0, %c0_1] : memref<1x64x1024xf32, #tpu.memory_space<vmem>>, vector<1x64x1024xf32>
    %2 = vector.shape_cast %1 : vector<1x64x1024xf32> to vector<64x1024xf32>
    %3 = tpu.iota {dimensions = array<i32: 0>} : vector<64x1xi32>
    %4 = tpu.iota {dimensions = array<i32: 1>} : vector<1x1024xi32>
    %5 = vector.broadcast %0 : i32 to vector<1x1024xi32>
    %6 = arith.addi %4, %5 : vector<1x1024xi32>
    %false = arith.constant false
    %7 = vector.broadcast %false : i1 to vector<64x1xi1>
    %c2_i32 = arith.constant 2 : i32
    %8 = arith.muli %arg0, %c2_i32 : i32
    %c0_i32 = arith.constant 0 : i32
    %9 = arith.addi %8, %c0_i32 : i32
    %10 = arith.index_cast %9 : i32 to index
    %11 = memref.load %arg4[%10] : memref<4xi32, #tpu.memory_space<smem>>
    %12 = vector.broadcast %11 : i32 to vector<64x1xi32>
    %13 = arith.cmpi sge, %3, %12 : vector<64x1xi32>
    %c6_i32 = arith.constant 6 : i32
    %14 = arith.addi %11, %c6_i32 : i32
    %15 = vector.broadcast %14 : i32 to vector<64x1xi32>
    %16 = arith.cmpi slt, %3, %15 : vector<64x1xi32>
    %17 = arith.andi %13, %16 : vector<64x1xi1>
    %18 = arith.ori %7, %17 : vector<64x1xi1>
    %c2_i32_2 = arith.constant 2 : i32
    %19 = arith.muli %arg0, %c2_i32_2 : i32
    %c1_i32 = arith.constant 1 : i32
    %20 = arith.addi %19, %c1_i32 : i32
    %21 = arith.index_cast %20 : i32 to index
    %22 = memref.load %arg4[%21] : memref<4xi32, #tpu.memory_space<smem>>
    %23 = vector.broadcast %22 : i32 to vector<64x1xi32>
    %24 = arith.cmpi sge, %3, %23 : vector<64x1xi32>
    %c6_i32_3 = arith.constant 6 : i32
    %25 = arith.addi %22, %c6_i32_3 : i32
    %26 = vector.broadcast %25 : i32 to vector<64x1xi32>
    %27 = arith.cmpi slt, %3, %26 : vector<64x1xi32>
    %28 = arith.andi %24, %27 : vector<64x1xi1>
    %29 = arith.ori %18, %28 : vector<64x1xi1>
    %false_4 = arith.constant false
    %30 = vector.broadcast %false_4 : i1 to vector<1x1024xi1>
    %c2_i32_5 = arith.constant 2 : i32
    %31 = arith.muli %arg0, %c2_i32_5 : i32
    %c0_i32_6 = arith.constant 0 : i32
    %32 = arith.addi %31, %c0_i32_6 : i32
    %33 = arith.index_cast %32 : i32 to index
    %34 = memref.load %arg5[%33] : memref<4xi32, #tpu.memory_space<smem>>
    %35 = vector.broadcast %34 : i32 to vector<1x1024xi32>
    %36 = arith.cmpi sge, %6, %35 : vector<1x1024xi32>
    %c24_i32 = arith.constant 24 : i32
    %37 = arith.addi %34, %c24_i32 : i32
    %38 = vector.broadcast %37 : i32 to vector<1x1024xi32>
    %39 = arith.cmpi slt, %6, %38 : vector<1x1024xi32>
    %40 = arith.andi %36, %39 : vector<1x1024xi1>
    %41 = arith.ori %30, %40 : vector<1x1024xi1>
    %c2_i32_7 = arith.constant 2 : i32
    %42 = arith.muli %arg0, %c2_i32_7 : i32
    %c1_i32_8 = arith.constant 1 : i32
    %43 = arith.addi %42, %c1_i32_8 : i32
    %44 = arith.index_cast %43 : i32 to index
    %45 = memref.load %arg5[%44] : memref<4xi32, #tpu.memory_space<smem>>
    %46 = vector.broadcast %45 : i32 to vector<1x1024xi32>
    %47 = arith.cmpi sge, %6, %46 : vector<1x1024xi32>
    %c24_i32_9 = arith.constant 24 : i32
    %48 = arith.addi %45, %c24_i32_9 : i32
    %49 = vector.broadcast %48 : i32 to vector<1x1024xi32>
    %50 = arith.cmpi slt, %6, %49 : vector<1x1024xi32>
    %51 = arith.andi %47, %50 : vector<1x1024xi1>
    %52 = arith.ori %41, %51 : vector<1x1024xi1>
    %53 = vector.broadcast %29 : vector<64x1xi1> to vector<64x1024xi1>
    %54 = vector.broadcast %52 : vector<1x1024xi1> to vector<64x1024xi1>
    %55 = arith.ori %53, %54 : vector<64x1024xi1>
    %c2_i32_10 = arith.constant 2 : i32
    %56 = arith.muli %arg0, %c2_i32_10 : i32
    %c0_i32_11 = arith.constant 0 : i32
    %57 = arith.addi %56, %c0_i32_11 : i32
    %58 = arith.index_cast %57 : i32 to index
    %59 = memref.load %arg2[%58] : memref<4xi32, #tpu.memory_space<smem>>
    %c2_i32_12 = arith.constant 2 : i32
    %60 = arith.muli %arg0, %c2_i32_12 : i32
    %c0_i32_13 = arith.constant 0 : i32
    %61 = arith.addi %60, %c0_i32_13 : i32
    %62 = arith.index_cast %61 : i32 to index
    %63 = memref.load %arg3[%62] : memref<4xi32, #tpu.memory_space<smem>>
    %64 = vector.broadcast %59 : i32 to vector<64x1xi32>
    %65 = arith.cmpi sge, %3, %64 : vector<64x1xi32>
    %c8_i32 = arith.constant 8 : i32
    %66 = arith.addi %59, %c8_i32 : i32
    %67 = vector.broadcast %66 : i32 to vector<64x1xi32>
    %68 = arith.cmpi slt, %3, %67 : vector<64x1xi32>
    %69 = arith.andi %65, %68 : vector<64x1xi1>
    %70 = vector.broadcast %63 : i32 to vector<1x1024xi32>
    %71 = arith.cmpi sge, %6, %70 : vector<1x1024xi32>
    %c32_i32 = arith.constant 32 : i32
    %72 = arith.addi %63, %c32_i32 : i32
    %73 = vector.broadcast %72 : i32 to vector<1x1024xi32>
    %74 = arith.cmpi slt, %6, %73 : vector<1x1024xi32>
    %75 = arith.andi %71, %74 : vector<1x1024xi1>
    %76 = vector.broadcast %69 : vector<64x1xi1> to vector<64x1024xi1>
    %77 = vector.broadcast %75 : vector<1x1024xi1> to vector<64x1024xi1>
    %78 = arith.andi %76, %77 : vector<64x1024xi1>
    %79 = arith.ori %55, %78 : vector<64x1024xi1>
    %c2_i32_14 = arith.constant 2 : i32
    %80 = arith.muli %arg0, %c2_i32_14 : i32
    %c1_i32_15 = arith.constant 1 : i32
    %81 = arith.addi %80, %c1_i32_15 : i32
    %82 = arith.index_cast %81 : i32 to index
    %83 = memref.load %arg2[%82] : memref<4xi32, #tpu.memory_space<smem>>
    %c2_i32_16 = arith.constant 2 : i32
    %84 = arith.muli %arg0, %c2_i32_16 : i32
    %c1_i32_17 = arith.constant 1 : i32
    %85 = arith.addi %84, %c1_i32_17 : i32
    %86 = arith.index_cast %85 : i32 to index
    %87 = memref.load %arg3[%86] : memref<4xi32, #tpu.memory_space<smem>>
    %88 = vector.broadcast %83 : i32 to vector<64x1xi32>
    %89 = arith.cmpi sge, %3, %88 : vector<64x1xi32>
    %c8_i32_18 = arith.constant 8 : i32
    %90 = arith.addi %83, %c8_i32_18 : i32
    %91 = vector.broadcast %90 : i32 to vector<64x1xi32>
    %92 = arith.cmpi slt, %3, %91 : vector<64x1xi32>
    %93 = arith.andi %89, %92 : vector<64x1xi1>
    %94 = vector.broadcast %87 : i32 to vector<1x1024xi32>
    %95 = arith.cmpi sge, %6, %94 : vector<1x1024xi32>
    %c32_i32_19 = arith.constant 32 : i32
    %96 = arith.addi %87, %c32_i32_19 : i32
    %97 = vector.broadcast %96 : i32 to vector<1x1024xi32>
    %98 = arith.cmpi slt, %6, %97 : vector<1x1024xi32>
    %99 = arith.andi %95, %98 : vector<1x1024xi1>
    %100 = vector.broadcast %93 : vector<64x1xi1> to vector<64x1024xi1>
    %101 = vector.broadcast %99 : vector<1x1024xi1> to vector<64x1024xi1>
    %102 = arith.andi %100, %101 : vector<64x1024xi1>
    %103 = arith.ori %79, %102 : vector<64x1024xi1>
    %cst = arith.constant 0.000000e+00 : f32
    %104 = vector.broadcast %cst : f32 to vector<64x1024xf32>
    %105 = arith.select %103, %104, %2 : vector<64x1024xi1>, vector<64x1024xf32>
    %c0_20 = arith.constant 0 : index
    %c0_21 = arith.constant 0 : index
    %c0_22 = arith.constant 0 : index
    %106 = vector.load %arg7[%c0_20, %c0_21, %c0_22] : memref<1x64x1024xf32, #tpu.memory_space<vmem>>, vector<1x64x1024xf32>
    %107 = vector.shape_cast %106 : vector<1x64x1024xf32> to vector<64x1024xf32>
    %108 = vector.shape_cast %105 : vector<64x1024xf32> to vector<1x64x1024xf32>
    tpu.vector_store %arg7[%c0_20, %c0_21, %c0_22], %108 {strides = array<i32>} : memref<1x64x1024xf32, #tpu.memory_space<vmem>>, vector<1x64x1024xf32>,
    return
  }
  func.func @transform_0(%arg0: i32, %arg1: i32, %arg2: memref<4xi32, #tpu.memory_space<smem>>, %arg3: memref<4xi32, #tpu.memory_space<smem>>, %arg4: memref<4xi32, #tpu.memory_space<smem>>, %arg5: memref<4xi32, #tpu.memory_space<smem>>) -> (i32, i32, i32) {
    %c0_i32 = arith.constant 0 : i32
    %c0_i32_0 = arith.constant 0 : i32
    return %arg0, %c0_i32, %arg1 : i32, i32, i32
  }
  func.func @transform_1(%arg0: i32, %arg1: i32, %arg2: memref<4xi32, #tpu.memory_space<smem>>, %arg3: memref<4xi32, #tpu.memory_space<smem>>, %arg4: memref<4xi32, #tpu.memory_space<smem>>, %arg5: memref<4xi32, #tpu.memory_space<smem>>) -> (i32, i32, i32) {
    %c0_i32 = arith.constant 0 : i32
    %c0_i32_0 = arith.constant 0 : i32
    return %arg0, %c0_i32, %arg1 : i32, i32, i32
  }
}

</mosaic_0001>

<bundles_post_ra>
// kernel: spectrogram_augmentation.1
= control target key start
LH: loop header
LB: loop body
LE: loop exit
PB: predicated region body
PF: predicated region fallthrough
CT: control target
= control target key end

     0   :  { %s2986_s0 = inlined_call_operand.vmem [shape: s32[4], index: 0, kind: input, shape index: {}]   ;;  %s2987_s4 = inlined_call_operand.hbm [shape: f32[2,64,1024], index: 4, kind: input, shape index: {}]   ;;  %s2988_s5 = inlined_call_operand.hbm [shape: f32[2,64,1024], index: 5, kind: output, shape index: {}]   ;;  %s2989_s1 = inlined_call_operand.vmem [shape: s32[4], index: 1, kind: input, shape index: {}]   ;;  %s2990_s2 = inlined_call_operand.vmem [shape: s32[4], index: 2, kind: input, shape index: {}]   ;;  %s2991_s3 = inlined_call_operand.vmem [shape: s32[4], index: 3, kind: input, shape index: {}]  }
   0x1   :  { %s10_s20 = sshll.u32 %s2986_s0, 4  ;;  %s14_s23 = sshll.u32 %s2989_s1, 4  ;;  %s11_s20 = int_to_ptr.vmem [resolvable:$true] %s10_s20  ;;  %s15_s23 = int_to_ptr.vmem [resolvable:$true] %s14_s23 }
   0x2   :  { %s1246_s24 = scalar_lea.vmem %s11_s20, 16  ;;  %p1251_p1 = scmp.lt.s32.totalorder %s11_s20, %s11_s20 }
   0x3   :  { %p1247_p0 = scmp.ne.s32.totalorder %s11_s20, %s1246_s24  ;;  %p1252_p2 = scmp.lt.s32.totalorder %s1246_s24, %s1246_s24 }
   0x5   :  { %p1253_p3 = por %p1252_p2, %p1251_p1 }
   0x7   :  { %p1254_p4 = pnand %p1253_p3, %p1247_p0 }
   0x9   :  { %1257 = shalt.err (!%p1254_p4)  }
   0xa   :  { %s1410_s25 = smov [#allocation3]   ;;  %s1258_s26 = scalar_lea.vmem %s15_s23, 16 }
   0xb   :  { %13 = dma.vmem_to_smem %s11_s20, 16, %s1410_s25, [#allocation2] }
   0xc   :  { %p1259_p5 = scmp.ne.s32.totalorder %s15_s23, %s1258_s26  ;;  %p1263_p6 = scmp.lt.s32.totalorder %s15_s23, %s15_s23 }
   0xd   :  { %p1264_p7 = scmp.lt.s32.totalorder %s1258_s26, %s1258_s26 }
   0xf   :  { %p1265_p8 = por %p1264_p7, %p1263_p6 }
  0x11   :  { %p1266_p9 = pnand %p1265_p8, %p1259_p5 }
  0x13   :  { %1269 = shalt.err (!%p1266_p9)  }
  0x14   :  { %s1411_s0 = smov [#allocation4]   ;;  %s18_s28 = sshll.u32 %s2990_s2, 4  ;;  %s19_s28 = int_to_ptr.vmem [resolvable:$true] %s18_s28 }
  0x15   :  { %17 = dma.vmem_to_smem %s15_s23, 16, %s1411_s0, [#allocation2] }
  0x16   :  { %s22_s6 = sshll.u32 %s2991_s3, 4  ;;  %s1270_s7 = scalar_lea.vmem %s19_s28, 16  ;;  %s23_s6 = int_to_ptr.vmem [resolvable:$true] %s22_s6 }
  0x17   :  { %p1271_p10 = scmp.ne.s32.totalorder %s19_s28, %s1270_s7  ;;  %p1275_p11 = scmp.lt.s32.totalorder %s19_s28, %s19_s28 }
  0x18   :  { %p1276_p12 = scmp.lt.s32.totalorder %s1270_s7, %s1270_s7 }
  0x1a   :  { %p1277_p13 = por %p1276_p12, %p1275_p11 }
  0x1c   :  { %p1278_p0 = pnand %p1277_p13, %p1271_p10 }
  0x1e   :  { %1281 = shalt.err (!%p1278_p0)  }
  0x1f   :  { %s1412_s8 = smov [#allocation5]   ;;  %s1282_s9 = scalar_lea.vmem %s23_s6, 16 }
  0x20   :  { %21 = dma.vmem_to_smem %s19_s28, 16, %s1412_s8, [#allocation2] }
  0x21   :  { %p1283_p1 = scmp.ne.s32.totalorder %s23_s6, %s1282_s9  ;;  %p1287_p2 = scmp.lt.s32.totalorder %s23_s6, %s23_s6 }
  0x22   :  { %p1288_p3 = scmp.lt.s32.totalorder %s1282_s9, %s1282_s9 }
  0x24   :  { %p1289_p4 = por %p1288_p3, %p1287_p2 }
  0x26   :  { %p1290_p5 = pnand %p1289_p4, %p1283_p1 }
  0x28   :  { %1293 = shalt.err (!%p1290_p5)  }
  0x29   :  { %s1413_s2 = smov [#allocation6]  }
  0x2a   :  { %25 = dma.vmem_to_smem %s23_s6, 16, %s1413_s2, [#allocation2] }
  0x2b   :  { %1376 = dma.done.wait [#allocation2], 64 }
  0x2c   :  { %1377 = vsyncadd [#allocation2], 4294967232 }
  0x2d   :  { %27 = sfence }
  0x2e   :  { %28 = vsyncpa [#allocation8], 0 }
  0x2f   :  { %30 = vsyncpa [#allocation8 + $0x1], 0 }
  0x30   :  { %31 = vsyncpa [#allocation9], 0 }
  0x31   :  { %33 = vsyncpa [#allocation9 + $0x1], 0  ;;  %s1462_s3 = smov 0   ;;  %s1464_s10 = smov 0  }
  0x32   :  { %s1466_s11 = smov 0   ;;  %s1468_s12 = smov 0  }
  0x33   :  { %s1470_s13 = smov 0   ;;  %s1472_s14 = smov 0  }
  0x34 LB: > { %s1158_s15 = sadd.s32 4294967295, %s1408_s14   ;;  %s1159_s16 = sadd.s32 4294967294, %s1408_s14   ;;  %s1408_s14 = sphi %s1472_s14, %s39_s14   ;;  %s1404_s13 = sphi %s1470_s13, %s3314_s13   ;;  %s1400_s12 = sphi %s1468_s12, %s3313_s12   ;;  %s1396_s11 = sphi %s1466_s11, %s3312_s11   ;;  %s1392_s10 = sphi %s1464_s10, %s3311_s10   ;;  %s1388_s3 = sphi %s1462_s3, %s3310_s3  }
  0x35   : > { %s51_s17 = sadd.s32 1, %s1404_s13  ;;  %s60_s18 = sadd.s32 1, %s1396_s11 }
  0x36   : > { %p53_p6 = scmp.ge.s32.totalorder %s51_s17, 2  ;;  %p67_p7 = scmp.ne.s32.totalorder %s1396_s11, %s1392_s10 }
  0x37   : > { %p68_p8 = scmp.eq.s32.totalorder %s1408_s14, 0  ;;  %p73_p9 = scmp.ne.s32.totalorder %s1392_s10, %s1388_s3 }
  0x38   : > { %s3316_s17 = smov (%p53_p6, %s51_s17), 0  ;;  %p74_p11 = scmp.eq.s32.totalorder %s1158_s15, 0 }
  0x39   : > { %p1503_p10 = por %p68_p8, %p67_p7  ;;  %s55_s20 = ssub.s32 %s1404_s13, %s3316_s17 }
  0x3a   : > { %p99_p12 = scmp.eq.s32.totalorder %s1158_s15, 1  ;;  %p58_p13 = scmp.eq.s32.totalorder %s55_s20, 0 }
  0x3b   : > { %p1509_p0 = por %p74_p11, %p73_p9  ;;  %p105_p2 = scmp.eq.s32.totalorder %s1159_s16, 1 }
  0x3c   : > { %p1513_p1 = por %p99_p12, %p67_p7  ;;  %p1188_p5 = scmp.lt.s32.totalorder %s1408_s14, 2 }
  0x3d   : > { %s1518_s23 = scalar_select %p58_p13, %s1396_s11, %s60_s18  }
  0x3e   : > { %s3050_s22 = scalar_select %p1513_p1, 1, 0 }
  0x3f   : > { %p1520_p3 = por %p105_p2, %p73_p9  ;;  %s125_s25 = sand.u32 1, %s1396_s11  }
  0x40   : > { %s1162_s26 = sshll.u32 %s125_s25, 9  ;;  %s1174_s0 = sshll.u32 %s1404_s13, 13 }
  0x41   : > { %s3051_s24 = scalar_select %p1520_p3, 1, 0 }
  0x42   : > { %s1531_s28 = scalar_lea.hbm %s2987_s4, %s1174_s0  ;;  %s129_s29 = scalar_lea.vmem [#allocation7], %s1162_s26 }
  0x43   : > { %s138_s30 = sshll.u32 %s129_s29, 4  ;;  %p1537_p6 = pnand %p1188_p5, %p1503_p10  ;;  %s1533_s30 = int_to_ptr.vmem [resolvable:$true] %s138_s30 }
  0x44   : > { %s1542_s7 = scalar_lea.sflag [#allocation8], %s125_s25  ;;  %s1294_s8 = scalar_lea.hbm %s1531_s28, 8192 }
  0x45   : > { %p1295_p8 = scmp.ne.s32.totalorder %s1531_s28, %s1294_s8  ;;  %p1296_p9 = pneg %p1537_p6 }
  0x46   : > { %s1299_s15 = scalar_lea.hbm %s2987_s4, 16384  ;;  %p1300_p10 = scmp.lt.u32.totalorder %s1531_s28, %s2987_s4 }
  0x47   : > { %p1297_p11 = pnand %p1296_p9, %p1295_p8  ;;  %p1301_p13 = scmp.lt.u32.totalorder %s1299_s15, %s1294_s8 }
  0x48   : > { %p1303_p5 = scmp.lt.u32.totalorder %s1294_s8, %s1531_s28 }
  0x49   : > { %p1298_p12 = pneg %p1297_p11  ;;  %p1302_p2 = por %p1301_p13, %p1300_p10 }
  0x4b   : > { %p1304_p4 = por %p1303_p5, %p1302_p2 }
  0x4d   : > { %p1305_p7 = pnand %p1304_p4, %p1298_p12 }
  0x4f   : > { %1308 = shalt.err (!%p1305_p7)
}
  0x50   : > { %s1309_s19 = scalar_lea.vmem %s1533_s30, 8192  ;;  %s1414_s20 = smov [#allocation7]  }
  0x51   : > { %p1310_p8 = scmp.ne.s32.totalorder %s1533_s30, %s1309_s19  ;;  %s1314_s25 = sshll.u32 %s1414_s20, 4  ;;  %s1315_s25 = int_to_ptr.vmem [resolvable:$false] %s1314_s25 }
  0x52   : > { %s1316_s26 = scalar_lea.vmem %s1315_s25, 16384  ;;  %p1317_p1 = scmp.lt.s32.totalorder %s1533_s30, %s1315_s25 }
  0x53   : > { %p1312_p11 = pnand %p1310_p8, %p1296_p9  ;;  %p1318_p10 = scmp.lt.s32.totalorder %s1316_s26, %s1309_s19 }
  0x55   : > { %p1313_p3 = pneg %p1312_p11  ;;  %p1319_p13 = por %p1318_p10, %p1317_p1 }
  0x57   : > { %p1320_p2 = pnand %p1319_p13, %p1313_p3 }
  0x59   : > { %1323 = shalt.err (!%p1320_p2)
}
  0x5a   : > { %s1415_s0 = smov 1024   ;;  %s1416_s1 = smov 64  }
  0x5b   : > { %1183 = dma.hbm_to_vmem [thread:$0]  (!%p1537_p6), %s1531_s28, 8192, %s1533_s30, %s1542_s7, %s1415_s0, %s1415_s0, %s1416_s1  }
  0x5c   : > { %p146_p4 = scmp.lt.s32.totalorder %s1408_s14, 3  ;;  %p3053_p7 = scmp.ge.s32.totalorder %s1408_s14, 1 }
  0x5e   : > { %p147_p9 = pnand %p3053_p7, %p146_p4 }
  0x5f   : > { %s1574_s27 = sand.u32 (!%p147_p9), 1, %s1392_s10  }
  0x60   : > { %150 = sbr.rel (%p147_p9) target bundleno = 530 (0x212), region = 24  ;;  %s1166_s29 = sshll.u32 (!%p147_p9), %s1574_s27, 9 }
  0x61   : > { %s153_s8 = scalar_lea.sflag (!%p147_p9), [#allocation8], %s1574_s27  ;;  %s1580_s9 = scalar_lea.vmem (!%p147_p9), [#allocation7], %s1166_s29 }
  0x67   : > { %1379 = dma.done.wait (%p1509_p0), %s153_s8, 8192  }
  0x68   : > { %1381 = vsyncadd (%p1509_p0), %s153_s8, 4294959104  ;;  %s1168_s28 = sshll.u32 %s1400_s12, 1  ;;  %v242_v0 = vlaneseq  ;;  %v3056_v16 = vmov 0  ;;  %v3060_v22 = vmov 0  ;;  %v3062_v24 = vmov 0  ;;  %v178_v25 = vld [vmem:[%s1580_s9] sm:$0xff] }
  0x69   : > { %s270_s30 = sld [smem:[#allocation5 + %s1168_s28]]  ;;  %s298_s6 = sadd.s32 1, %s1168_s28  ;;  %v3064_v26 = vmov 0  ;;  %v3066_v29 = vmov 0  ;;  %v3068_v31 = vmov 0  ;;  %v179_v32 = vld [vmem:[%s1580_s9 + $0x8] sm:$0xff] }
  0x6a   : > { %s299_s7 = sld [smem:[#allocation5 + %s298_s6]]  ;;  %v1595_v1 = vshrl.u32 %v242_v0, 7  ;;  %v1597_v2 = vand.u32 127, %v242_v0  ;;  %v3070_v33 = vmov 0  ;;  %v3072_v35 = vmov 0  ;;  %v180_v38 = vld [vmem:[%s1580_s9 + $0x10] sm:$0xff] }
  0x6b   : > { %s335_s2 = sld [smem:[#allocation6 + %s1168_s28]]  ;;  %v3074_v37 = vmov 0  ;;  %v3076_v39 = vmov 0  ;;  %v3078_v41 = vmov 0  ;;  %v3080_v43 = vmov 0  ;;  %v181_v44 = vld [vmem:[%s1580_s9 + $0x18] sm:$0xff] }
  0x6c   : > { %s363_s15 = sld [smem:[#allocation6 + %s298_s6]]  ;;  %v253_v23 = vadd.s32 128, %v1597_v2  ;;  %v1717_v27 = vadd.s32 896, %v1597_v2  ;;  %v254_v30 = vadd.s32 256, %v1597_v2  ;;  %v255_v36 = vadd.s32 384, %v1597_v2  ;;  %v182_v50 = vld [vmem:[%s1580_s9 + $0x20] sm:$0xff] }
  0x6d   : > { %s1587_s16 = sld [smem:[#allocation3 + %s1168_s28]]  ;;  %v256_v42 = vadd.s32 512, %v1597_v2  ;;  %v3082_v45 = vmov 0  ;;  %v3084_v47 = vmov 0  ;;  %v257_v48 = vadd.s32 640, %v1597_v2  ;;  %v183_v56 = vld [vmem:[%s1580_s9 + $0x28] sm:$0xff] }
  0x6e   : > { %s1589_s18 = sld [smem:[#allocation4 + %s1168_s28]]  ;;  %v3086_v49 = vmov 0  ;;  %v3088_v51 = vmov 0  ;;  %v3090_v53 = vmov 0  ;;  %v258_v54 = vadd.s32 768, %v1597_v2  ;;  %v184_v61 = vld [vmem:[%s1580_s9 + $0x30] sm:$0xff] }
  0x6f   : > { %s1591_s19 = sld [smem:[#allocation3 + %s298_s6]]  ;;  %v1599_v3 = vstv %s270_s30  ;;  %s280_s21 = sadd.s32 6, %s270_s30  ;;  %v3092_v55 = vmov 0  ;;  %v3094_v57 = vmov 0  ;;  %v3096_v59 = vmov 0  ;;  %v187_v21 = vld [vmem:[%s1580_s9 + $0x48] sm:$0xff] }
  0x70   : > { %s1593_s20 = sld [smem:[#allocation4 + %s298_s6]]  ;;  %vm272_vm0 = vcmp.ge.s32.totalorder %v1595_v1, %v1599_v3  ;;  %v1603_v4 = vstv %s280_s21  ;;  %v1605_v5 = vstv %s299_s7  ;;  %s309_s25 = sadd.s32 6, %s299_s7  ;;  %v3098_v60 = vmov 0  ;;  %v198_v12 = vld [vmem:[%s1580_s9 + $0xa0] sm:$0xff] }
  0x71   : > { %v1607_v6 = vstv %s335_s2  ;;  %s345_s26 = sadd.s32 24, %s335_s2  ;;  %vm282_vm1 = vcmp.lt.s32.totalorder %v1595_v1, %v1603_v4  ;;  %vm301_vm2 = vcmp.ge.s32.totalorder %v1595_v1, %v1605_v5  ;;  %v1613_v7 = vstv %s309_s25  ;;  %s1721_s6 = scalar_lea.vmem [#allocation10], %s1166_s29 }
  0x72   : > { %vm337_vm3 = vcmp.ge.s32.totalorder %v1597_v2, %v1607_v6  ;;  %s373_s0 = sadd.s32 24, %s363_s15  ;;  %vm290_vm4 = vmand %vm272_vm0, %vm282_vm1  ;;  %vm311_vm5 = vcmp.lt.s32.totalorder %v1595_v1, %v1613_v7  ;;  %v1620_v8 = vstv %s345_s26  ;;  %v1622_v9 = vstv %s363_s15  ;;  %s1175_s29 = sshll.u32 %s1400_s12, 13 }
  0x73   : > { %s506_s1 = sadd.s32 8, %s1587_s16  ;;  %v1624_v10 = vstv %s373_s0  ;;  %vm319_vm6 = vmand %vm301_vm2, %vm311_vm5  ;;  %vm347_vm7 = vcmp.lt.s32.totalorder %v1597_v2, %v1620_v8  ;;  %vm365_vm8 = vcmp.ge.s32.totalorder %v1597_v2, %v1622_v9  ;;  %v1634_v11 = vstv %s1587_s16  ;;  %s1071_s7 = sshll.u32 %s1721_s6, 4  ;;  %s2936_s7 = int_to_ptr.vmem [resolvable:$true] %s1071_s7 }
  0x74   : > { %s533_s8 = sadd.s32 32, %s1589_s18  ;;  %vm375_vm9 = vcmp.lt.s32.totalorder %v1597_v2, %v1624_v10  ;;  %vm1636_vm10 = vmor %vm290_vm4, %vm319_vm6  ;;  %v1640_v13 = vstv %s506_s1  ;;  %v1643_v14 = vstv %s1589_s18  ;;  %vm498_vm13 = vcmp.ge.s32.totalorder %v1595_v1, %v1634_v11  ;;  %s2934_s16 = scalar_lea.hbm %s2988_s5, %s1175_s29 }
  0x75   : > { %v1645_v15 = vstv %s533_s8  ;;  %s722_s28 = sadd.s32 8, %s1591_s19  ;;  %vm355_vm11 = vmand %vm337_vm3, %vm347_vm7  ;;  %vm508_vm14 = vcmp.lt.s32.totalorder %v1595_v1, %v1640_v13  ;;  %vm525_vm0 = vcmp.ge.s32.totalorder %v1597_v2, %v1643_v14  ;;  %v1665_v17 = vstv %s1591_s19  ;;  %s1056_s12 = scalar_lea.sflag [#allocation9], %s1574_s27 }
  0x76   : > { %s749_s30 = sadd.s32 32, %s1593_s20  ;;  %vm383_vm12 = vmand %vm365_vm8, %vm375_vm9  ;;  %vm535_vm1 = vcmp.lt.s32.totalorder %v1597_v2, %v1645_v15  ;;  %v1667_v18 = vstv %s722_s28  ;;  %v1674_v19 = vstv %s1593_s20  ;;  %vm714_vm5 = vcmp.ge.s32.totalorder %v1595_v1, %v1665_v17  ;;  %p3307_p1 = scmp.ne.s32.totalorder %s3050_s22, 0 }
  0x77   : > { %vm1656_vm15 = vmor %vm355_vm11, %vm383_vm12  ;;  %v1676_v20 = vstv %s749_s30  ;;  %vm724_vm6 = vcmp.lt.s32.totalorder %v1595_v1, %v1667_v18  ;;  %vm741_vm8 = vcmp.ge.s32.totalorder %v1597_v2, %v1674_v19  ;;  %v3100_v62 = vmov 0  ;;  %s1417_s18 = smov [#allocation10]  }
  0x78   : > { %v3057_v16 = vsel %vm1656_vm15, 4294967295, %v3056_v16  ;;  %vm431_vm2 = vmor %vm1636_vm10, %vm1656_vm15  ;;  %vm751_vm9 = vcmp.lt.s32.totalorder %v1597_v2, %v1676_v20  ;;  %v3107_v0 = vmov 0  ;;  %v244_v2 = vadd.s32 8, %v1595_v1  ;;  %s1328_s19 = sshll.u32 %s1417_s18, 4  ;;  %s1329_s19 = int_to_ptr.vmem [resolvable:$false] %s1328_s19 }
  0x79   : > { %vm1678_vm3 = vmand %vm498_vm13, %vm508_vm14  ;;  %vm338_vm14 = vcmp.ge.s32.totalorder %v253_v23, %v1607_v6  ;;  %s1330_s20 = scalar_lea.vmem %s1329_s19, 16384  ;;  %p1331_p12 = scmp.lt.s32.totalorder %s2936_s7, %s1329_s19 }
  0x7a   : > { %vm1682_vm4 = vmand %vm525_vm0, %vm535_vm1  ;;  %vm348_vm0 = vcmp.lt.s32.totalorder %v253_v23, %v1620_v8 }
  0x7b   : > { %v3061_v22 = vsel %vm1682_vm4, 4294967295, %v3060_v22  ;;  %vm583_vm7 = vmand %vm1678_vm3, %vm1682_vm4 }
  0x7c   : > { %vm647_vm11 = vmor %vm431_vm2, %vm583_vm7  ;;  %vm366_vm2 = vcmp.ge.s32.totalorder %v253_v23, %v1622_v9 }
  0x7d   : > { %vm1699_vm12 = vmand %vm714_vm5, %vm724_vm6  ;;  %vm376_vm5 = vcmp.lt.s32.totalorder %v253_v23, %v1624_v10 }
  0x7e   : > { %v3063_v24 = vsel %vm1699_vm12, 4294967295, %v3062_v24  ;;  %vm1704_vm13 = vmand %vm741_vm8, %vm751_vm9  ;;  %vm526_vm9 = vcmp.ge.s32.totalorder %v253_v23, %v1643_v14 }
  0x7f   : > { %v3065_v26 = vsel %vm1704_vm13, 4294967295, %v3064_v26  ;;  %vm799_vm1 = vmand %vm1699_vm12, %vm1704_vm13  ;;  %vm536_vm13 = vcmp.lt.s32.totalorder %v253_v23, %v1645_v15 }
  0x80   : > { %vm863_vm6 = vmor %vm647_vm11, %vm799_vm1  ;;  %vm742_vm11 = vcmp.ge.s32.totalorder %v253_v23, %v1674_v19  ;;  %vm752_vm1 = vcmp.lt.s32.totalorder %v253_v23, %v1676_v20 }
  0x81   : > { %v927_v28 = vsel %vm863_vm6, 0.0, %v178_v25  ;;  %vm356_vm7 = vmand %vm338_vm14, %vm348_vm0  ;;  %vm349_vm0 = vcmp.lt.s32.totalorder %v254_v30, %v1620_v8 }
  0x82   : > { %991 = vst [vmem:[%s1721_s6] sm:$0xff] %v927_v28  ;;  %vm384_vm8 = vmand %vm366_vm2, %vm376_vm5  ;;  %vm339_vm2 = vcmp.ge.s32.totalorder %v254_v30, %v1607_v6 }
  0x83   : > { %vm1726_vm4 = vmor %vm356_vm7, %vm384_vm8 }
  0x84   : > { %v3067_v29 = vsel %vm1726_vm4, 4294967295, %v3066_v29  ;;  %vm432_vm14 = vmor %vm1636_vm10, %vm1726_vm4  ;;  %vm537_vm4 = vcmp.lt.s32.totalorder %v254_v30, %v1645_v15 }
  0x85   : > { %vm1745_vm7 = vmand %vm526_vm9, %vm536_vm13 }
  0x86   : > { %v3069_v31 = vsel %vm1745_vm7, 4294967295, %v3068_v31  ;;  %vm584_vm13 = vmand %vm1678_vm3, %vm1745_vm7  ;;  %vm527_vm7 = vcmp.ge.s32.totalorder %v254_v30, %v1643_v14 }
  0x87   : > { %vm648_vm9 = vmor %vm432_vm14, %vm584_vm13  ;;  %vm367_vm14 = vcmp.ge.s32.totalorder %v254_v30, %v1622_v9  ;;  %vm377_vm13 = vcmp.lt.s32.totalorder %v254_v30, %v1624_v10 }
  0x88   : > { %vm1766_vm8 = vmand %vm742_vm11, %vm752_vm1 }
  0x89   : > { %v3071_v33 = vsel %vm1766_vm8, 4294967295, %v3070_v33  ;;  %vm800_vm5 = vmand %vm1699_vm12, %vm1766_vm8 }
  0x8a   : > { %vm864_vm6 = vmor %vm648_vm9, %vm800_vm5 }
  0x8b   : > { %v928_v34 = vsel %vm864_vm6, 0.0, %v179_v32  ;;  %vm357_vm11 = vmand %vm339_vm2, %vm349_vm0  ;;  %vm743_vm0 = vcmp.ge.s32.totalorder %v254_v30, %v1674_v19  ;;  %vm753_vm2 = vcmp.lt.s32.totalorder %v254_v30, %v1676_v20  ;;  %v190_v30 = vld [vmem:[%s1580_s9 + $0x60] sm:$0xff] }
  0x8c   : > { %992 = vst [vmem:[%s1721_s6 + $0x8] sm:$0xff] %v928_v34  ;;  %vm385_vm1 = vmand %vm367_vm14, %vm377_vm13  ;;  %v191_v34 = vld [vmem:[%s1580_s9 + $0x68] sm:$0xff] }
  0x8d   : > { %vm1781_vm15 = vmor %vm357_vm11, %vm385_vm1  ;;  %vm368_vm11 = vcmp.ge.s32.totalorder %v255_v36, %v1622_v9  ;;  %vm378_vm1 = vcmp.lt.s32.totalorder %v255_v36, %v1624_v10 }
  0x8e   : > { %v3073_v35 = vsel %vm1781_vm15, 4294967295, %v3072_v35  ;;  %vm433_vm8 = vmor %vm1636_vm10, %vm1781_vm15 }
  0x8f   : > { %vm1790_vm5 = vmand %vm527_vm7, %vm537_vm4  ;;  %vm340_vm4 = vcmp.ge.s32.totalorder %v255_v36, %v1607_v6  ;;  %vm350_vm7 = vcmp.lt.s32.totalorder %v255_v36, %v1620_v8 }
  0x90   : > { %v3075_v37 = vsel %vm1790_vm5, 4294967295, %v3074_v37  ;;  %vm585_vm6 = vmand %vm1678_vm3, %vm1790_vm5  ;;  %vm538_vm5 = vcmp.lt.s32.totalorder %v255_v36, %v1645_v15 }
  0x91   : > { %vm649_vm9 = vmor %vm433_vm8, %vm585_vm6  ;;  %vm528_vm6 = vcmp.ge.s32.totalorder %v255_v36, %v1643_v14 }
  0x92   : > { %vm1801_vm14 = vmand %vm743_vm0, %vm753_vm2 }
  0x93   : > { %v3077_v39 = vsel %vm1801_vm14, 4294967295, %v3076_v39  ;;  %vm801_vm13 = vmand %vm1699_vm12, %vm1801_vm14 }
  0x94   : > { %vm865_vm8 = vmor %vm649_vm9, %vm801_vm13 }
  0x95   : > { %v929_v40 = vsel %vm865_vm8, 0.0, %v180_v38  ;;  %vm358_vm0 = vmand %vm340_vm4, %vm350_vm7  ;;  %vm744_vm4 = vcmp.ge.s32.totalorder %v255_v36, %v1674_v19  ;;  %vm754_vm7 = vcmp.lt.s32.totalorder %v255_v36, %v1676_v20  ;;  %vm351_vm8 = vcmp.lt.s32.totalorder %v256_v42, %v1620_v8  ;;  %v192_v38 = vld [vmem:[%s1580_s9 + $0x70] sm:$0xff] }
  0x96   : > { %993 = vst [vmem:[%s1721_s6 + $0x10] sm:$0xff] %v929_v40  ;;  %vm386_vm2 = vmand %vm368_vm11, %vm378_vm1  ;;  %v245_v40 = vadd.s32 16, %v1595_v1 }
  0x97   : > { %vm1816_vm15 = vmor %vm358_vm0, %vm386_vm2  ;;  %vm369_vm2 = vcmp.ge.s32.totalorder %v256_v42, %v1622_v9 }
  0x98   : > { %v3079_v41 = vsel %vm1816_vm15, 4294967295, %v3078_v41  ;;  %vm434_vm14 = vmor %vm1636_vm10, %vm1816_vm15 }
  0x99   : > { %vm1825_vm9 = vmand %vm528_vm6, %vm538_vm5  ;;  %vm341_vm5 = vcmp.ge.s32.totalorder %v256_v42, %v1607_v6  ;;  %vm379_vm6 = vcmp.lt.s32.totalorder %v256_v42, %v1624_v10 }
  0x9a   : > { %v3081_v43 = vsel %vm1825_vm9, 4294967295, %v3080_v43  ;;  %vm586_vm13 = vmand %vm1678_vm3, %vm1825_vm9  ;;  %vm539_vm9 = vcmp.lt.s32.totalorder %v256_v42, %v1645_v15 }
  0x9b   : > { %vm650_vm11 = vmor %vm434_vm14, %vm586_vm13  ;;  %vm529_vm13 = vcmp.ge.s32.totalorder %v256_v42, %v1643_v14 }
  0x9c   : > { %vm1836_vm1 = vmand %vm744_vm4, %vm754_vm7 }
  0x9d   : > { %v3083_v45 = vsel %vm1836_vm1, 4294967295, %v3082_v45  ;;  %vm802_vm0 = vmand %vm1699_vm12, %vm1836_vm1 }
  0x9e   : > { %vm866_vm14 = vmor %vm650_vm11, %vm802_vm0 }
  0x9f   : > { %v930_v46 = vsel %vm866_vm14, 0.0, %v181_v44  ;;  %vm359_vm4 = vmand %vm341_vm5, %vm351_vm8  ;;  %vm745_vm5 = vcmp.ge.s32.totalorder %v256_v42, %v1674_v19  ;;  %vm755_vm8 = vcmp.lt.s32.totalorder %v256_v42, %v1676_v20  ;;  %vm352_vm14 = vcmp.lt.s32.totalorder %v257_v48, %v1620_v8  ;;  %v193_v44 = vld [vmem:[%s1580_s9 + $0x78] sm:$0xff] }
  0xa0   : > { %994 = vst [vmem:[%s1721_s6 + $0x18] sm:$0xff] %v930_v46  ;;  %vm387_vm7 = vmand %vm369_vm2, %vm379_vm6 }
  0xa1   : > { %vm1851_vm15 = vmor %vm359_vm4, %vm387_vm7  ;;  %vm370_vm7 = vcmp.ge.s32.totalorder %v257_v48, %v1622_v9 }
  0xa2   : > { %v3085_v47 = vsel %vm1851_vm15, 4294967295, %v3084_v47  ;;  %vm435_vm1 = vmor %vm1636_vm10, %vm1851_vm15 }
  0xa3   : > { %vm1860_vm11 = vmand %vm529_vm13, %vm539_vm9  ;;  %vm342_vm9 = vcmp.ge.s32.totalorder %v257_v48, %v1607_v6  ;;  %vm380_vm13 = vcmp.lt.s32.totalorder %v257_v48, %v1624_v10 }
  0xa4   : > { %v3087_v49 = vsel %vm1860_vm11, 4294967295, %v3086_v49  ;;  %vm587_vm0 = vmand %vm1678_vm3, %vm1860_vm11  ;;  %vm540_vm11 = vcmp.lt.s32.totalorder %v257_v48, %v1645_v15 }
  0xa5   : > { %vm651_vm2 = vmor %vm435_vm1, %vm587_vm0  ;;  %vm530_vm0 = vcmp.ge.s32.totalorder %v257_v48, %v1643_v14 }
  0xa6   : > { %vm1871_vm6 = vmand %vm745_vm5, %vm755_vm8 }
  0xa7   : > { %v3089_v51 = vsel %vm1871_vm6, 4294967295, %v3088_v51  ;;  %vm803_vm4 = vmand %vm1699_vm12, %vm1871_vm6 }
  0xa8   : > { %vm867_vm1 = vmor %vm651_vm2, %vm803_vm4 }
  0xa9   : > { %v931_v52 = vsel %vm867_vm1, 0.0, %v182_v50  ;;  %vm360_vm5 = vmand %vm342_vm9, %vm352_vm14  ;;  %vm746_vm9 = vcmp.ge.s32.totalorder %v257_v48, %v1674_v19  ;;  %vm756_vm14 = vcmp.lt.s32.totalorder %v257_v48, %v1676_v20  ;;  %vm353_vm1 = vcmp.lt.s32.totalorder %v258_v54, %v1620_v8  ;;  %v206_v48 = vld [vmem:[%s1580_s9 + $0xe0] sm:$0xff] }
  0xaa   : > { %995 = vst [vmem:[%s1721_s6 + $0x20] sm:$0xff] %v931_v52  ;;  %vm388_vm8 = vmand %vm370_vm7, %vm380_vm13  ;;  %v194_v52 = vld [vmem:[%s1580_s9 + $0x80] sm:$0xff] }
  0xab   : > { %vm1886_vm15 = vmor %vm360_vm5, %vm388_vm8  ;;  %vm371_vm8 = vcmp.ge.s32.totalorder %v258_v54, %v1622_v9 }
  0xac   : > { %v3091_v53 = vsel %vm1886_vm15, 4294967295, %v3090_v53  ;;  %vm436_vm6 = vmor %vm1636_vm10, %vm1886_vm15 }
  0xad   : > { %vm1895_vm2 = vmand %vm530_vm0, %vm540_vm11  ;;  %vm343_vm11 = vcmp.ge.s32.totalorder %v258_v54, %v1607_v6  ;;  %vm381_vm0 = vcmp.lt.s32.totalorder %v258_v54, %v1624_v10 }
  0xae   : > { %v3093_v55 = vsel %vm1895_vm2, 4294967295, %v3092_v55  ;;  %vm588_vm4 = vmand %vm1678_vm3, %vm1895_vm2  ;;  %vm541_vm2 = vcmp.lt.s32.totalorder %v258_v54, %v1645_v15 }
  0xaf   : > { %vm652_vm7 = vmor %vm436_vm6, %vm588_vm4  ;;  %vm531_vm4 = vcmp.ge.s32.totalorder %v258_v54, %v1643_v14 }
  0xb0   : > { %vm1906_vm13 = vmand %vm746_vm9, %vm756_vm14 }
  0xb1   : > { %v3095_v57 = vsel %vm1906_vm13, 4294967295, %v3094_v57  ;;  %vm804_vm5 = vmand %vm1699_vm12, %vm1906_vm13 }
  0xb2   : > { %vm868_vm6 = vmor %vm652_vm7, %vm804_vm5  ;;  %vm747_vm7 = vcmp.ge.s32.totalorder %v258_v54, %v1674_v19 }
  0xb3   : > { %v932_v58 = vsel %vm868_vm6, 0.0, %v183_v56  ;;  %vm361_vm9 = vmand %vm343_vm11, %vm353_vm1  ;;  %vm757_vm11 = vcmp.lt.s32.totalorder %v258_v54, %v1676_v20 }
  0xb4   : > { %996 = vst [vmem:[%s1721_s6 + $0x28] sm:$0xff] %v932_v58  ;;  %vm389_vm14 = vmand %vm371_vm8, %vm381_vm0  ;;  %v195_v58 = vld [vmem:[%s1580_s9 + $0x88] sm:$0xff] }
  0xb5   : > { %vm1921_vm15 = vmor %vm361_vm9, %vm389_vm14  ;;  %vm3103_vm9 = vcmp.lt.s32.totalorder %v1717_v27, %v1620_v8  ;;  %vm3104_vm14 = vcmp.ge.s32.totalorder %v1717_v27, %v1607_v6  ;;  %v3111_v6 = vmov 0  ;;  %v185_v8 = vld [vmem:[%s1580_s9 + $0x38] sm:$0xff] }
  0xb6   : > { %v3097_v59 = vsel %vm1921_vm15, 4294967295, %v3096_v59  ;;  %vm437_vm13 = vmor %vm1636_vm10, %vm1921_vm15 }
  0xb7   : > { %vm1929_vm12 = vmand %vm531_vm4, %vm541_vm2  ;;  %vm3102_vm2 = vnez %v3063_v24  ;;  %v188_v24 = vld [vmem:[%s1580_s9 + $0x50] sm:$0xff] }
  0xb8   : > { %v3099_v60 = vsel %vm1929_vm12, 4294967295, %v3098_v60  ;;  %vm589_vm1 = vmand %vm1678_vm3, %vm1929_vm12 }
  0xb9   : > { %vm653_vm5 = vmor %vm437_vm13, %vm589_vm1  ;;  %vm3105_vm13 = vcmp.lt.s32.totalorder %v1717_v27, %v1624_v10 }
  0xba   : > { %vm1940_vm8 = vmand %vm747_vm7, %vm757_vm11  ;;  %vm3106_vm7 = vcmp.ge.s32.totalorder %v1717_v27, %v1622_v9  ;;  %v3115_v9 = vmov 0 }
  0xbb   : > { %v3101_v62 = vsel %vm1940_vm8, 4294967295, %v3100_v62  ;;  %vm805_vm0 = vmand %vm3102_vm2, %vm1940_vm8 }
  0xbc   : > { %vm869_vm6 = vmor %vm653_vm5, %vm805_vm0  ;;  %vm3109_vm0 = vcmp.lt.s32.totalorder %v1717_v27, %v1645_v15  ;;  %v186_v15 = vld [vmem:[%s1580_s9 + $0x40] sm:$0xff] }
  0xbd   : > { %v933_v63 = vsel %vm869_vm6, 0.0, %v184_v61  ;;  %vm362_vm4 = vmand %vm3104_vm14, %vm3103_vm9  ;;  %vm3110_vm6 = vcmp.ge.s32.totalorder %v1717_v27, %v1643_v14 }
  0xbe   : > { %997 = vst [vmem:[%s1721_s6 + $0x30] sm:$0xff] %v933_v63  ;;  %vm390_vm11 = vmand %vm3106_vm7, %vm3105_vm13  ;;  %vm3114_vm13 = vcmp.ge.s32.totalorder %v1717_v27, %v1674_v19  ;;  %v196_v63 = vld [vmem:[%s1580_s9 + $0x90] sm:$0xff] }
  0xbf   : > { %vm1961_vm1 = vmor %vm362_vm4, %vm390_vm11  ;;  %vm273_vm11 = vcmp.ge.s32.totalorder %v244_v2, %v1599_v3 }
  0xc0   : > { %v3108_v0 = vsel %vm1961_vm1, 4294967295, %v3107_v0  ;;  %vm438_vm5 = vmor %vm1636_vm10, %vm1961_vm1  ;;  %vm3113_vm10 = vcmp.lt.s32.totalorder %v1717_v27, %v1676_v20  ;;  %vm509_vm1 = vcmp.lt.s32.totalorder %v244_v2, %v1640_v13  ;;  %v189_v27 = vld [vmem:[%s1580_s9 + $0x58] sm:$0xff] }
  0xc1   : > { %vm1976_vm9 = vmand %vm3110_vm6, %vm3109_vm0  ;;  %vm283_vm0 = vcmp.lt.s32.totalorder %v244_v2, %v1603_v4  ;;  %vm312_vm6 = vcmp.lt.s32.totalorder %v244_v2, %v1613_v7 }
  0xc2   : > { %v3112_v6 = vsel %vm1976_vm9, 4294967295, %v3111_v6  ;;  %vm590_vm14 = vmand %vm1678_vm3, %vm1976_vm9  ;;  %vm499_vm9 = vcmp.ge.s32.totalorder %v244_v2, %v1634_v11 }
  0xc3   : > { %vm654_vm4 = vmor %vm438_vm5, %vm590_vm14  ;;  %vm302_vm5 = vcmp.ge.s32.totalorder %v244_v2, %v1605_v5 }
  0xc4   : > { %vm1991_vm7 = vmand %vm3114_vm13, %vm3113_vm10 }
  0xc5   : > { %v3116_v9 = vsel %vm1991_vm7, 4294967295, %v3115_v9  ;;  %vm806_vm3 = vmand %vm3102_vm2, %vm1991_vm7  ;;  %vm3119_vm2 = vnez %v3057_v16 }
  0xc6   : > { %vm870_vm14 = vmor %vm654_vm4, %vm806_vm3  ;;  %vm3122_vm3 = vnez %v3061_v22 }
  0xc7   : > { %v934_v10 = vsel %vm870_vm14, 0.0, %v185_v8  ;;  %vm291_vm10 = vmand %vm273_vm11, %vm283_vm0  ;;  %vm715_vm11 = vcmp.ge.s32.totalorder %v244_v2, %v1665_v17  ;;  %vm725_vm0 = vcmp.lt.s32.totalorder %v244_v2, %v1667_v18  ;;  %v197_v8 = vld [vmem:[%s1580_s9 + $0x98] sm:$0xff] }
  0xc8   : > { %998 = vst [vmem:[%s1721_s6 + $0x38] sm:$0xff] %v934_v10  ;;  %vm320_vm13 = vmand %vm302_vm5, %vm312_vm6 }
  0xc9   : > { %vm2006_vm8 = vmor %vm291_vm10, %vm320_vm13  ;;  %vm3126_vm13 = vnez %v3067_v29 }
  0xca   : > { %vm439_vm7 = vmor %vm2006_vm8, %vm3119_vm2 }
  0xcb   : > { %vm2014_vm4 = vmand %vm499_vm9, %vm509_vm1  ;;  %vm3125_vm1 = vnez %v3065_v26 }
  0xcc   : > { %vm591_vm5 = vmand %vm2014_vm4, %vm3122_vm3 }
  0xcd   : > { %vm655_vm6 = vmor %vm439_vm7, %vm591_vm5  ;;  %vm3127_vm7 = vnez %v3069_v31  ;;  %vm3128_vm5 = vnez %v3071_v33 }
  0xce   : > { %vm2025_vm14 = vmand %vm715_vm11, %vm725_vm0 }
  0xcf   : > { %vm807_vm9 = vmand %vm2025_vm14, %vm3125_vm1  ;;  %vm3130_vm1 = vnez %v3075_v37 }
  0xd0   : > { %vm871_vm10 = vmor %vm655_vm6, %vm807_vm9 }
  0xd1   : > { %v935_v20 = vsel %vm871_vm10, 0.0, %v186_v15  ;;  %vm440_vm3 = vmor %vm2006_vm8, %vm3126_vm13  ;;  %vm3129_vm10 = vnez %v3073_v35  ;;  %v199_v15 = vld [vmem:[%s1580_s9 + $0xa8] sm:$0xff] }
  0xd2   : > { %999 = vst [vmem:[%s1721_s6 + $0x40] sm:$0xff] %v935_v20  ;;  %vm592_vm11 = vmand %vm2014_vm4, %vm3127_vm7  ;;  %v200_v20 = vld [vmem:[%s1580_s9 + $0xb0] sm:$0xff] }
  0xd3   : > { %vm656_vm0 = vmor %vm440_vm3, %vm592_vm11  ;;  %vm3131_vm11 = vnez %v3077_v39 }
  0xd4   : > { %vm808_vm6 = vmand %vm2025_vm14, %vm3128_vm5  ;;  %vm3133_vm5 = vnez %v3081_v43 }
  0xd5   : > { %vm872_vm9 = vmor %vm656_vm0, %vm808_vm6 }
  0xd6   : > { %v936_v23 = vsel %vm872_vm9, 0.0, %v187_v21  ;;  %vm441_vm13 = vmor %vm2006_vm8, %vm3129_vm10  ;;  %vm3132_vm9 = vnez %v3079_v41  ;;  %v246_v21 = vadd.s32 24, %v1595_v1 }
  0xd7   : > { %1000 = vst [vmem:[%s1721_s6 + $0x48] sm:$0xff] %v936_v23  ;;  %vm593_vm7 = vmand %vm2014_vm4, %vm3130_vm1 }
  0xd8   : > { %vm657_vm3 = vmor %vm441_vm13, %vm593_vm7  ;;  %vm3134_vm7 = vnez %v3083_v45 }
  0xd9   : > { %vm809_vm0 = vmand %vm2025_vm14, %vm3131_vm11  ;;  %vm3136_vm11 = vnez %v3087_v49 }
  0xda   : > { %vm873_vm6 = vmor %vm657_vm3, %vm809_vm0 }
  0xdb   : > { %v937_v25 = vsel %vm873_vm6, 0.0, %v188_v24  ;;  %vm442_vm10 = vmor %vm2006_vm8, %vm3132_vm9  ;;  %vm3135_vm6 = vnez %v3085_v47  ;;  %v201_v24 = vld [vmem:[%s1580_s9 + $0xb8] sm:$0xff] }
  0xdc   : > { %1001 = vst [vmem:[%s1721_s6 + $0x50] sm:$0xff] %v937_v25  ;;  %vm594_vm1 = vmand %vm2014_vm4, %vm3133_vm5 }
  0xdd   : > { %vm658_vm13 = vmor %vm442_vm10, %vm594_vm1  ;;  %vm3137_vm10 = vnez %v3089_v51 }
  0xde   : > { %vm810_vm3 = vmand %vm2025_vm14, %vm3134_vm7  ;;  %vm3139_vm7 = vnez %v3093_v55 }
  0xdf   : > { %vm874_vm0 = vmor %vm658_vm13, %vm810_vm3 }
  0xe0   : > { %v938_v28 = vsel %vm874_vm0, 0.0, %v189_v27  ;;  %vm443_vm9 = vmor %vm2006_vm8, %vm3135_vm6  ;;  %vm3138_vm0 = vnez %v3091_v53  ;;  %v214_v27 = vld [vmem:[%s1580_s9 + $0x120] sm:$0xff] }
  0xe1   : > { %1002 = vst [vmem:[%s1721_s6 + $0x58] sm:$0xff] %v938_v28  ;;  %vm595_vm5 = vmand %vm2014_vm4, %vm3136_vm11 }
  0xe2   : > { %vm659_vm1 = vmor %vm443_vm9, %vm595_vm5  ;;  %vm3140_vm9 = vnez %v3095_v57 }
  0xe3   : > { %vm811_vm13 = vmand %vm2025_vm14, %vm3137_vm10 }
  0xe4   : > { %vm875_vm3 = vmor %vm659_vm1, %vm811_vm13 }
  0xe5   : > { %v939_v32 = vsel %vm875_vm3, 0.0, %v190_v30  ;;  %vm444_vm6 = vmor %vm2006_vm8, %vm3138_vm0  ;;  %v202_v30 = vld [vmem:[%s1580_s9 + $0xc0] sm:$0xff] }
  0xe6   : > { %1003 = vst [vmem:[%s1721_s6 + $0x60] sm:$0xff] %v939_v32  ;;  %vm596_vm11 = vmand %vm2014_vm4, %vm3139_vm7 }
  0xe7   : > { %vm660_vm5 = vmor %vm444_vm6, %vm596_vm11  ;;  %vm3141_vm6 = vnez %v3101_v62 }
  0xe8   : > { %vm812_vm1 = vmand %vm2025_vm14, %vm3140_vm9 }
  0xe9   : > { %vm876_vm13 = vmor %vm660_vm5, %vm812_vm1  ;;  %vm3142_vm1 = vnez %v3108_v0 }
  0xea   : > { %v940_v36 = vsel %vm876_vm13, 0.0, %v191_v34  ;;  %vm445_vm3 = vmor %vm2006_vm8, %vm1921_vm15  ;;  %vm284_vm15 = vcmp.lt.s32.totalorder %v245_v40, %v1603_v4 }
  0xeb   : > { %1004 = vst [vmem:[%s1721_s6 + $0x68] sm:$0xff] %v940_v36  ;;  %vm597_vm7 = vmand %vm2014_vm4, %vm1929_vm12  ;;  %vm3143_vm12 = vnez %v3112_v6  ;;  %v203_v36 = vld [vmem:[%s1580_s9 + $0xc8] sm:$0xff] }
  0xec   : > { %vm661_vm11 = vmor %vm445_vm3, %vm597_vm7 }
  0xed   : > { %vm813_vm9 = vmand %vm2025_vm14, %vm3141_vm6  ;;  %vm274_vm6 = vcmp.ge.s32.totalorder %v245_v40, %v1599_v3 }
  0xee   : > { %vm877_vm5 = vmor %vm661_vm11, %vm813_vm9  ;;  %vm3144_vm9 = vnez %v3116_v9 }
  0xef   : > { %v941_v42 = vsel %vm877_vm5, 0.0, %v192_v38  ;;  %vm446_vm13 = vmor %vm2006_vm8, %vm3142_vm1  ;;  %vm303_vm5 = vcmp.ge.s32.totalorder %v245_v40, %v1605_v5  ;;  %vm313_vm8 = vcmp.lt.s32.totalorder %v245_v40, %v1613_v7 }
  0xf0   : > { %1005 = vst [vmem:[%s1721_s6 + $0x70] sm:$0xff] %v941_v42  ;;  %vm598_vm7 = vmand %vm2014_vm4, %vm3143_vm12 }
  0xf1   : > { %vm662_vm3 = vmor %vm446_vm13, %vm598_vm7  ;;  %vm500_vm13 = vcmp.ge.s32.totalorder %v245_v40, %v1634_v11  ;;  %vm510_vm7 = vcmp.lt.s32.totalorder %v245_v40, %v1640_v13 }
  0xf2   : > { %vm814_vm11 = vmand %vm2025_vm14, %vm3144_vm9 }
  0xf3   : > { %vm878_vm1 = vmor %vm662_vm3, %vm814_vm11 }
  0xf4   : > { %v942_v46 = vsel %vm878_vm1, 0.0, %v193_v44  ;;  %vm292_vm0 = vmand %vm274_vm6, %vm284_vm15  ;;  %vm716_vm15 = vcmp.ge.s32.totalorder %v245_v40, %v1665_v17  ;;  %vm726_vm6 = vcmp.lt.s32.totalorder %v245_v40, %v1667_v18  ;;  %vm3149_vm1 = vnez %v3061_v22  ;;  %v204_v40 = vld [vmem:[%s1580_s9 + $0xd0] sm:$0xff]  ;;  %v205_v44 = vld [vmem:[%s1580_s9 + $0xd8] sm:$0xff] }
  0xf5   : > { %1006 = vst [vmem:[%s1721_s6 + $0x78] sm:$0xff] %v942_v46  ;;  %vm321_vm4 = vmand %vm303_vm5, %vm313_vm8  ;;  %vm3152_vm8 = vnez %v3065_v26 }
  0xf6   : > { %vm2139_vm12 = vmor %vm292_vm0, %vm321_vm4 }
  0xf7   : > { %vm447_vm14 = vmor %vm2139_vm12, %vm3119_vm2 }
  0xf8   : > { %vm2147_vm3 = vmand %vm500_vm13, %vm510_vm7  ;;  %vm3153_vm7 = vnez %v3067_v29 }
  0xf9   : > { %vm599_vm0 = vmand %vm2147_vm3, %vm3149_vm1 }
  0xfa   : > { %vm663_vm11 = vmor %vm447_vm14, %vm599_vm0  ;;  %vm3154_vm14 = vnez %v3069_v31  ;;  %vm3155_vm0 = vnez %v3071_v33 }
  0xfb   : > { %vm2158_vm5 = vmand %vm716_vm15, %vm726_vm6 }
  0xfc   : > { %vm815_vm4 = vmand %vm2158_vm5, %vm3152_vm8  ;;  %vm3157_vm8 = vnez %v3075_v37 }
  0xfd   : > { %vm879_vm13 = vmor %vm663_vm11, %vm815_vm4 }
  0xfe   : > { %v943_v56 = vsel %vm879_vm13, 0.0, %v194_v52  ;;  %vm448_vm1 = vmor %vm2139_vm12, %vm3153_vm7  ;;  %vm3156_vm13 = vnez %v3073_v35  ;;  %v207_v52 = vld [vmem:[%s1580_s9 + $0xe8] sm:$0xff] }
  0xff   : > { %1007 = vst [vmem:[%s1721_s6 + $0x80] sm:$0xff] %v943_v56  ;;  %vm600_vm15 = vmand %vm2147_vm3, %vm3154_vm14  ;;  %v208_v56 = vld [vmem:[%s1580_s9 + $0xf0] sm:$0xff] }
 0x100   : > { %vm664_vm6 = vmor %vm448_vm1, %vm600_vm15  ;;  %vm3158_vm15 = vnez %v3077_v39 }
 0x101   : > { %vm816_vm11 = vmand %vm2158_vm5, %vm3155_vm0  ;;  %vm3160_vm0 = vnez %v3081_v43 }
 0x102   : > { %vm880_vm4 = vmor %vm664_vm6, %vm816_vm11 }
 0x103   : > { %v944_v61 = vsel %vm880_vm4, 0.0, %v195_v58  ;;  %vm449_vm7 = vmor %vm2139_vm12, %vm3156_vm13  ;;  %vm3159_vm4 = vnez %v3079_v41  ;;  %v247_v58 = vadd.s32 32, %v1595_v1 }
 0x104   : > { %1008 = vst [vmem:[%s1721_s6 + $0x88] sm:$0xff] %v944_v61  ;;  %vm601_vm14 = vmand %vm2147_vm3, %vm3157_vm8 }
 0x105   : > { %vm665_vm1 = vmor %vm449_vm7, %vm601_vm14  ;;  %vm3161_vm14 = vnez %v3083_v45 }
 0x106   : > { %vm817_vm6 = vmand %vm2158_vm5, %vm3158_vm15  ;;  %vm3163_vm15 = vnez %v3087_v49 }
 0x107   : > { %vm881_vm11 = vmor %vm665_vm1, %vm817_vm6 }
 0x108   : > { %v945_v2 = vsel %vm881_vm11, 0.0, %v196_v63  ;;  %vm450_vm13 = vmor %vm2139_vm12, %vm3159_vm4  ;;  %vm3162_vm11 = vnez %v3085_v47  ;;  %v209_v63 = vld [vmem:[%s1580_s9 + $0xf8] sm:$0xff] }
 0x109   : > { %1009 = vst [vmem:[%s1721_s6 + $0x90] sm:$0xff] %v945_v2  ;;  %vm602_vm8 = vmand %vm2147_vm3, %vm3160_vm0 }
 0x10a   : > { %vm666_vm7 = vmor %vm450_vm13, %vm602_vm8 }
 0x10b   : > { %vm818_vm1 = vmand %vm2158_vm5, %vm3161_vm14 }
 0x10c   : > { %vm882_vm6 = vmor %vm666_vm7, %vm818_vm1  ;;  %vm3164_vm1 = vnez %v3091_v53 }
 0x10d   : > { %v946_v10 = vsel %vm882_vm6, 0.0, %v197_v8  ;;  %vm451_vm4 = vmor %vm2139_vm12, %vm3162_vm11  ;;  %vm3165_vm11 = vnez %v3093_v55  ;;  %v222_v8 = vld [vmem:[%s1580_s9 + $0x160] sm:$0xff] }
 0x10e   : > { %1010 = vst [vmem:[%s1721_s6 + $0x98] sm:$0xff] %v946_v10  ;;  %vm603_vm0 = vmand %vm2147_vm3, %vm3163_vm15 }
 0x10f   : > { %vm667_vm8 = vmor %vm451_vm4, %vm603_vm0  ;;  %vm3166_vm4 = vnez %v3095_v57 }
 0x110   : > { %vm819_vm13 = vmand %vm2158_vm5, %vm3137_vm10  ;;  %vm3168_vm10 = vnez %v3099_v60 }
 0x111   : > { %vm883_vm7 = vmor %vm667_vm8, %vm819_vm13 }
 0x112   : > { %v947_v14 = vsel %vm883_vm7, 0.0, %v198_v12  ;;  %vm452_vm6 = vmor %vm2139_vm12, %vm3164_vm1  ;;  %vm3167_vm7 = vnez %v3097_v59  ;;  %v210_v12 = vld [vmem:[%s1580_s9 + $0x100] sm:$0xff] }
 0x113   : > { %1011 = vst [vmem:[%s1721_s6 + $0xa0] sm:$0xff] %v947_v14  ;;  %vm604_vm15 = vmand %vm2147_vm3, %vm3165_vm11 }
 0x114   : > { %vm668_vm0 = vmor %vm452_vm6, %vm604_vm15  ;;  %vm3169_vm6 = vnez %v3101_v62 }
 0x115   : > { %vm820_vm8 = vmand %vm2158_vm5, %vm3166_vm4 }
 0x116   : > { %vm884_vm13 = vmor %vm668_vm0, %vm820_vm8  ;;  %vm3170_vm8 = vnez %v3108_v0 }
 0x117   : > { %v948_v19 = vsel %vm884_vm13, 0.0, %v199_v15  ;;  %vm453_vm1 = vmor %vm2139_vm12, %vm3167_vm7  ;;  %vm285_vm7 = vcmp.lt.s32.totalorder %v246_v21, %v1603_v4 }
 0x118   : > { %1012 = vst [vmem:[%s1721_s6 + $0xa8] sm:$0xff] %v948_v19  ;;  %vm605_vm11 = vmand %vm2147_vm3, %vm3168_vm10  ;;  %vm3171_vm10 = vnez %v3112_v6  ;;  %v211_v19 = vld [vmem:[%s1580_s9 + $0x108] sm:$0xff] }
 0x119   : > { %vm669_vm15 = vmor %vm453_vm1, %vm605_vm11 }
 0x11a   : > { %vm821_vm4 = vmand %vm2158_vm5, %vm3169_vm6  ;;  %vm275_vm6 = vcmp.ge.s32.totalorder %v246_v21, %v1599_v3 }
 0x11b   : > { %vm885_vm0 = vmor %vm669_vm15, %vm821_vm4  ;;  %vm304_vm15 = vcmp.ge.s32.totalorder %v246_v21, %v1605_v5 }
 0x11c   : > { %v949_v23 = vsel %vm885_vm0, 0.0, %v200_v20  ;;  %vm454_vm13 = vmor %vm2139_vm12, %vm3170_vm8  ;;  %vm314_vm12 = vcmp.lt.s32.totalorder %v246_v21, %v1613_v7 }
 0x11d   : > { %1013 = vst [vmem:[%s1721_s6 + $0xb0] sm:$0xff] %v949_v23  ;;  %vm606_vm11 = vmand %vm2147_vm3, %vm3171_vm10 }
 0x11e   : > { %vm670_vm1 = vmor %vm454_vm13, %vm606_vm11  ;;  %vm501_vm13 = vcmp.ge.s32.totalorder %v246_v21, %v1634_v11  ;;  %vm511_vm11 = vcmp.lt.s32.totalorder %v246_v21, %v1640_v13 }
 0x11f   : > { %vm822_vm4 = vmand %vm2158_vm5, %vm3144_vm9 }
 0x120   : > { %vm886_vm0 = vmor %vm670_vm1, %vm822_vm4  ;;  %vm3176_vm4 = vnez %v3061_v22 }
 0x121   : > { %v950_v25 = vsel %vm886_vm0, 0.0, %v201_v24  ;;  %vm293_vm8 = vmand %vm275_vm6, %vm285_vm7  ;;  %vm717_vm7 = vcmp.ge.s32.totalorder %v246_v21, %v1665_v17  ;;  %vm727_vm6 = vcmp.lt.s32.totalorder %v246_v21, %v1667_v18  ;;  %vm3179_vm0 = vnez %v3065_v26  ;;  %v212_v21 = vld [vmem:[%s1580_s9 + $0x110] sm:$0xff]  ;;  %v213_v24 = vld [vmem:[%s1580_s9 + $0x118] sm:$0xff] }
 0x122   : > { %1014 = vst [vmem:[%s1721_s6 + $0xb8] sm:$0xff] %v950_v25  ;;  %vm322_vm3 = vmand %vm304_vm15, %vm314_vm12 }
 0x123   : > { %vm2272_vm10 = vmor %vm293_vm8, %vm322_vm3 }
 0x124   : > { %vm455_vm5 = vmor %vm2272_vm10, %vm3119_vm2 }
 0x125   : > { %vm2280_vm1 = vmand %vm501_vm13, %vm511_vm11  ;;  %vm3180_vm11 = vnez %v3067_v29 }
 0x126   : > { %vm607_vm8 = vmand %vm2280_vm1, %vm3176_vm4 }
 0x127   : > { %vm671_vm15 = vmor %vm455_vm5, %vm607_vm8  ;;  %vm3181_vm5 = vnez %v3069_v31  ;;  %vm3182_vm8 = vnez %v3071_v33 }
 0x128   : > { %vm2291_vm12 = vmand %vm717_vm7, %vm727_vm6 }
 0x129   : > { %vm823_vm3 = vmand %vm2291_vm12, %vm3179_vm0  ;;  %vm3184_vm0 = vnez %v3075_v37 }
 0x12a   : > { %vm887_vm13 = vmor %vm671_vm15, %vm823_vm3 }
 0x12b   : > { %v951_v34 = vsel %vm887_vm13, 0.0, %v202_v30  ;;  %vm456_vm4 = vmor %vm2272_vm10, %vm3180_vm11  ;;  %vm3183_vm13 = vnez %v3073_v35  ;;  %v215_v30 = vld [vmem:[%s1580_s9 + $0x128] sm:$0xff] }
 0x12c   : > { %1015 = vst [vmem:[%s1721_s6 + $0xc0] sm:$0xff] %v951_v34  ;;  %vm608_vm7 = vmand %vm2280_vm1, %vm3181_vm5  ;;  %v216_v34 = vld [vmem:[%s1580_s9 + $0x130] sm:$0xff] }
 0x12d   : > { %vm672_vm6 = vmor %vm456_vm4, %vm608_vm7  ;;  %vm3185_vm7 = vnez %v3077_v39 }
 0x12e   : > { %vm824_vm15 = vmand %vm2291_vm12, %vm3182_vm8  ;;  %vm3187_vm8 = vnez %v3081_v43 }
 0x12f   : > { %vm888_vm3 = vmor %vm672_vm6, %vm824_vm15 }
 0x130   : > { %v952_v38 = vsel %vm888_vm3, 0.0, %v203_v36  ;;  %vm457_vm11 = vmor %vm2272_vm10, %vm3183_vm13  ;;  %vm3186_vm3 = vnez %v3079_v41  ;;  %v248_v36 = vadd.s32 40, %v1595_v1 }
 0x131   : > { %1016 = vst [vmem:[%s1721_s6 + $0xc8] sm:$0xff] %v952_v38  ;;  %vm609_vm5 = vmand %vm2280_vm1, %vm3184_vm0 }
 0x132   : > { %vm673_vm4 = vmor %vm457_vm11, %vm609_vm5 }
 0x133   : > { %vm825_vm6 = vmand %vm2291_vm12, %vm3185_vm7 }
 0x134   : > { %vm889_vm15 = vmor %vm673_vm4, %vm825_vm6  ;;  %vm3188_vm6 = vnez %v3085_v47 }
 0x135   : > { %v953_v42 = vsel %vm889_vm15, 0.0, %v204_v40  ;;  %vm458_vm13 = vmor %vm2272_vm10, %vm3186_vm3  ;;  %vm3189_vm3 = vnez %v3087_v49  ;;  %v217_v40 = vld [vmem:[%s1580_s9 + $0x138] sm:$0xff] }
 0x136   : > { %1017 = vst [vmem:[%s1721_s6 + $0xd0] sm:$0xff] %v953_v42  ;;  %vm610_vm0 = vmand %vm2280_vm1, %vm3187_vm8 }
 0x137   : > { %vm674_vm11 = vmor %vm458_vm13, %vm610_vm0  ;;  %vm3190_vm13 = vnez %v3089_v51 }
 0x138   : > { %vm826_vm5 = vmand %vm2291_vm12, %vm3161_vm14  ;;  %vm3192_vm14 = vnez %v3093_v55 }
 0x139   : > { %vm890_vm4 = vmor %vm674_vm11, %vm826_vm5 }
 0x13a   : > { %v954_v46 = vsel %vm890_vm4, 0.0, %v205_v44  ;;  %vm459_vm15 = vmor %vm2272_vm10, %vm3188_vm6  ;;  %vm3191_vm4 = vnez %v3091_v53  ;;  %v230_v44 = vld [vmem:[%s1580_s9 + $0x1a0] sm:$0xff] }
 0x13b   : > { %1018 = vst [vmem:[%s1721_s6 + $0xd8] sm:$0xff] %v954_v46  ;;  %vm611_vm8 = vmand %vm2280_vm1, %vm3189_vm3 }
 0x13c   : > { %vm675_vm0 = vmor %vm459_vm15, %vm611_vm8  ;;  %vm3193_vm15 = vnez %v3095_v57 }
 0x13d   : > { %vm827_vm11 = vmand %vm2291_vm12, %vm3190_vm13  ;;  %vm3195_vm13 = vnez %v3099_v60 }
 0x13e   : > { %vm891_vm5 = vmor %vm675_vm0, %vm827_vm11 }
 0x13f   : > { %v955_v50 = vsel %vm891_vm5, 0.0, %v206_v48  ;;  %vm460_vm6 = vmor %vm2272_vm10, %vm3191_vm4  ;;  %vm3194_vm5 = vnez %v3097_v59  ;;  %v218_v48 = vld [vmem:[%s1580_s9 + $0x140] sm:$0xff] }
 0x140   : > { %1019 = vst [vmem:[%s1721_s6 + $0xe0] sm:$0xff] %v955_v50  ;;  %vm612_vm3 = vmand %vm2280_vm1, %vm3192_vm14 }
 0x141   : > { %vm676_vm8 = vmor %vm460_vm6, %vm612_vm3  ;;  %vm3196_vm6 = vnez %v3101_v62 }
 0x142   : > { %vm828_vm0 = vmand %vm2291_vm12, %vm3193_vm15 }
 0x143   : > { %vm892_vm11 = vmor %vm676_vm8, %vm828_vm0  ;;  %vm3197_vm0 = vnez %v3108_v0 }
 0x144   : > { %v956_v54 = vsel %vm892_vm11, 0.0, %v207_v52  ;;  %vm461_vm4 = vmor %vm2272_vm10, %vm3194_vm5  ;;  %vm286_vm5 = vcmp.lt.s32.totalorder %v247_v58, %v1603_v4 }
 0x145   : > { %1020 = vst [vmem:[%s1721_s6 + $0xe8] sm:$0xff] %v956_v54  ;;  %vm613_vm14 = vmand %vm2280_vm1, %vm3195_vm13  ;;  %vm3198_vm13 = vnez %v3112_v6  ;;  %v219_v54 = vld [vmem:[%s1580_s9 + $0x148] sm:$0xff] }
 0x146   : > { %vm677_vm3 = vmor %vm461_vm4, %vm613_vm14 }
 0x147   : > { %vm829_vm15 = vmand %vm2291_vm12, %vm3196_vm6  ;;  %vm276_vm6 = vcmp.ge.s32.totalorder %v247_v58, %v1599_v3 }
 0x148   : > { %vm893_vm8 = vmor %vm677_vm3, %vm829_vm15  ;;  %vm305_vm3 = vcmp.ge.s32.totalorder %v247_v58, %v1605_v5 }
 0x149   : > { %v957_v61 = vsel %vm893_vm8, 0.0, %v208_v56  ;;  %vm462_vm11 = vmor %vm2272_vm10, %vm3197_vm0  ;;  %vm315_vm10 = vcmp.lt.s32.totalorder %v247_v58, %v1613_v7 }
 0x14a   : > { %1021 = vst [vmem:[%s1721_s6 + $0xf0] sm:$0xff] %v957_v61  ;;  %vm614_vm14 = vmand %vm2280_vm1, %vm3198_vm13 }
 0x14b   : > { %vm678_vm4 = vmor %vm462_vm11, %vm614_vm14  ;;  %vm502_vm11 = vcmp.ge.s32.totalorder %v247_v58, %v1634_v11  ;;  %vm512_vm14 = vcmp.lt.s32.totalorder %v247_v58, %v1640_v13 }
 0x14c   : > { %vm830_vm15 = vmand %vm2291_vm12, %vm3144_vm9 }
 0x14d   : > { %vm894_vm8 = vmor %vm678_vm4, %vm830_vm15  ;;  %vm3203_vm15 = vnez %v3061_v22 }
 0x14e   : > { %v958_v2 = vsel %vm894_vm8, 0.0, %v209_v63  ;;  %vm294_vm0 = vmand %vm276_vm6, %vm286_vm5  ;;  %vm718_vm5 = vcmp.ge.s32.totalorder %v247_v58, %v1665_v17  ;;  %vm728_vm6 = vcmp.lt.s32.totalorder %v247_v58, %v1667_v18  ;;  %vm3206_vm8 = vnez %v3065_v26  ;;  %v220_v58 = vld [vmem:[%s1580_s9 + $0x150] sm:$0xff]  ;;  %v221_v63 = vld [vmem:[%s1580_s9 + $0x158] sm:$0xff] }
 0x14f   : > { %1022 = vst [vmem:[%s1721_s6 + $0xf8] sm:$0xff] %v958_v2  ;;  %vm323_vm1 = vmand %vm305_vm3, %vm315_vm10 }
 0x150   : > { %vm2405_vm13 = vmor %vm294_vm0, %vm323_vm1 }
 0x151   : > { %vm463_vm12 = vmor %vm2405_vm13, %vm3119_vm2 }
 0x152   : > { %vm2413_vm4 = vmand %vm502_vm11, %vm512_vm14  ;;  %vm3207_vm14 = vnez %v3067_v29 }
 0x153   : > { %vm615_vm0 = vmand %vm2413_vm4, %vm3203_vm15 }
 0x154   : > { %vm679_vm3 = vmor %vm463_vm12, %vm615_vm0  ;;  %vm3208_vm12 = vnez %v3069_v31  ;;  %vm3209_vm0 = vnez %v3071_v33 }
 0x155   : > { %vm2424_vm10 = vmand %vm718_vm5, %vm728_vm6 }
 0x156   : > { %vm831_vm1 = vmand %vm2424_vm10, %vm3206_vm8  ;;  %vm3211_vm8 = vnez %v3075_v37 }
 0x157   : > { %vm895_vm11 = vmor %vm679_vm3, %vm831_vm1 }
 0x158   : > { %v959_v15 = vsel %vm895_vm11, 0.0, %v210_v12  ;;  %vm464_vm15 = vmor %vm2405_vm13, %vm3207_vm14  ;;  %vm3210_vm11 = vnez %v3073_v35  ;;  %v223_v12 = vld [vmem:[%s1580_s9 + $0x168] sm:$0xff] }
 0x159   : > { %1023 = vst [vmem:[%s1721_s6 + $0x100] sm:$0xff] %v959_v15  ;;  %vm616_vm5 = vmand %vm2413_vm4, %vm3208_vm12  ;;  %v224_v15 = vld [vmem:[%s1580_s9 + $0x170] sm:$0xff] }
 0x15a   : > { %vm680_vm6 = vmor %vm464_vm15, %vm616_vm5 }
 0x15b   : > { %vm832_vm3 = vmand %vm2424_vm10, %vm3209_vm0 }
 0x15c   : > { %vm896_vm1 = vmor %vm680_vm6, %vm832_vm3  ;;  %vm3212_vm3 = vnez %v3079_v41 }
 0x15d   : > { %v960_v20 = vsel %vm896_vm1, 0.0, %v211_v19  ;;  %vm465_vm14 = vmor %vm2405_vm13, %vm3210_vm11  ;;  %vm3213_vm11 = vnez %v3081_v43  ;;  %v249_v19 = vadd.s32 48, %v1595_v1 }
 0x15e   : > { %1024 = vst [vmem:[%s1721_s6 + $0x108] sm:$0xff] %v960_v20  ;;  %vm617_vm12 = vmand %vm2413_vm4, %vm3211_vm8 }
 0x15f   : > { %vm681_vm15 = vmor %vm465_vm14, %vm617_vm12  ;;  %vm3214_vm12 = vnez %v3083_v45 }
 0x160   : > { %vm833_vm5 = vmand %vm2424_vm10, %vm3185_vm7  ;;  %vm3216_vm7 = vnez %v3087_v49 }
 0x161   : > { %vm897_vm6 = vmor %vm681_vm15, %vm833_vm5 }
 0x162   : > { %v961_v23 = vsel %vm897_vm6, 0.0, %v212_v21  ;;  %vm466_vm1 = vmor %vm2405_vm13, %vm3212_vm3  ;;  %vm3215_vm6 = vnez %v3085_v47  ;;  %v225_v21 = vld [vmem:[%s1580_s9 + $0x178] sm:$0xff] }
 0x163   : > { %1025 = vst [vmem:[%s1721_s6 + $0x110] sm:$0xff] %v961_v23  ;;  %vm618_vm8 = vmand %vm2413_vm4, %vm3213_vm11 }
 0x164   : > { %vm682_vm14 = vmor %vm466_vm1, %vm618_vm8  ;;  %vm3217_vm1 = vnez %v3089_v51 }
 0x165   : > { %vm834_vm15 = vmand %vm2424_vm10, %vm3214_vm12  ;;  %vm3219_vm12 = vnez %v3093_v55 }
 0x166   : > { %vm898_vm5 = vmor %vm682_vm14, %vm834_vm15 }
 0x167   : > { %v962_v25 = vsel %vm898_vm5, 0.0, %v213_v24  ;;  %vm467_vm3 = vmor %vm2405_vm13, %vm3215_vm6  ;;  %vm3218_vm5 = vnez %v3091_v53 }
 0x168   : > { %1026 = vst [vmem:[%s1721_s6 + $0x118] sm:$0xff] %v962_v25  ;;  %vm619_vm11 = vmand %vm2413_vm4, %vm3216_vm7 }
 0x169   : > { %vm683_vm8 = vmor %vm467_vm3, %vm619_vm11  ;;  %vm3220_vm3 = vnez %v3095_v57 }
 0x16a   : > { %vm835_vm14 = vmand %vm2424_vm10, %vm3217_vm1  ;;  %vm3222_vm1 = vnez %v3099_v60 }
 0x16b   : > { %vm899_vm15 = vmor %vm683_vm8, %vm835_vm14 }
 0x16c   : > { %v963_v28 = vsel %vm899_vm15, 0.0, %v214_v27  ;;  %vm468_vm6 = vmor %vm2405_vm13, %vm3218_vm5  ;;  %vm3221_vm15 = vnez %v3097_v59  ;;  %v226_v27 = vld [vmem:[%s1580_s9 + $0x180] sm:$0xff] }
 0x16d   : > { %1027 = vst [vmem:[%s1721_s6 + $0x120] sm:$0xff] %v963_v28  ;;  %vm620_vm7 = vmand %vm2413_vm4, %vm3219_vm12 }
 0x16e   : > { %vm684_vm11 = vmor %vm468_vm6, %vm620_vm7  ;;  %vm3223_vm6 = vnez %v3101_v62 }
 0x16f   : > { %vm836_vm8 = vmand %vm2424_vm10, %vm3220_vm3 }
 0x170   : > { %vm900_vm14 = vmor %vm684_vm11, %vm836_vm8  ;;  %vm3224_vm8 = vnez %v3108_v0 }
 0x171   : > { %v964_v32 = vsel %vm900_vm14, 0.0, %v215_v30  ;;  %vm469_vm5 = vmor %vm2405_vm13, %vm3221_vm15  ;;  %vm287_vm15 = vcmp.lt.s32.totalorder %v248_v36, %v1603_v4 }
 0x172   : > { %1028 = vst [vmem:[%s1721_s6 + $0x128] sm:$0xff] %v964_v32  ;;  %vm621_vm12 = vmand %vm2413_vm4, %vm3222_vm1  ;;  %vm3225_vm1 = vnez %v3112_v6  ;;  %v227_v32 = vld [vmem:[%s1580_s9 + $0x188] sm:$0xff] }
 0x173   : > { %vm685_vm7 = vmor %vm469_vm5, %vm621_vm12 }
 0x174   : > { %vm837_vm3 = vmand %vm2424_vm10, %vm3223_vm6  ;;  %vm277_vm6 = vcmp.ge.s32.totalorder %v248_v36, %v1599_v3 }
 0x175   : > { %vm901_vm11 = vmor %vm685_vm7, %vm837_vm3  ;;  %vm306_vm7 = vcmp.ge.s32.totalorder %v248_v36, %v1605_v5 }
 0x176   : > { %v965_v38 = vsel %vm901_vm11, 0.0, %v216_v34  ;;  %vm470_vm14 = vmor %vm2405_vm13, %vm3224_vm8  ;;  %vm316_vm13 = vcmp.lt.s32.totalorder %v248_v36, %v1613_v7 }
 0x177   : > { %1029 = vst [vmem:[%s1721_s6 + $0x130] sm:$0xff] %v965_v38  ;;  %vm622_vm12 = vmand %vm2413_vm4, %vm3225_vm1 }
 0x178   : > { %vm686_vm5 = vmor %vm470_vm14, %vm622_vm12  ;;  %vm503_vm14 = vcmp.ge.s32.totalorder %v248_v36, %v1634_v11  ;;  %vm513_vm12 = vcmp.lt.s32.totalorder %v248_v36, %v1640_v13 }
 0x179   : > { %vm838_vm3 = vmand %vm2424_vm10, %vm3144_vm9 }
 0x17a   : > { %vm902_vm11 = vmor %vm686_vm5, %vm838_vm3  ;;  %vm3230_vm3 = vnez %v3061_v22 }
 0x17b   : > { %v966_v42 = vsel %vm902_vm11, 0.0, %v217_v40  ;;  %vm295_vm8 = vmand %vm277_vm6, %vm287_vm15  ;;  %vm719_vm15 = vcmp.ge.s32.totalorder %v248_v36, %v1665_v17  ;;  %vm729_vm6 = vcmp.lt.s32.totalorder %v248_v36, %v1667_v18  ;;  %vm3233_vm11 = vnez %v3065_v26  ;;  %v228_v36 = vld [vmem:[%s1580_s9 + $0x190] sm:$0xff]  ;;  %v229_v40 = vld [vmem:[%s1580_s9 + $0x198] sm:$0xff] }
 0x17c   : > { %1030 = vst [vmem:[%s1721_s6 + $0x138] sm:$0xff] %v966_v42  ;;  %vm324_vm4 = vmand %vm306_vm7, %vm316_vm13 }
 0x17d   : > { %vm2538_vm1 = vmor %vm295_vm8, %vm324_vm4 }
 0x17e   : > { %vm471_vm10 = vmor %vm2538_vm1, %vm3119_vm2 }
 0x17f   : > { %vm2546_vm5 = vmand %vm503_vm14, %vm513_vm12  ;;  %vm3234_vm12 = vnez %v3067_v29 }
 0x180   : > { %vm623_vm8 = vmand %vm2546_vm5, %vm3230_vm3 }
 0x181   : > { %vm687_vm7 = vmor %vm471_vm10, %vm623_vm8  ;;  %vm3235_vm10 = vnez %v3069_v31 }
 0x182   : > { %vm2557_vm13 = vmand %vm719_vm15, %vm729_vm6 }
 0x183   : > { %vm839_vm4 = vmand %vm2557_vm13, %vm3233_vm11 }
 0x184   : > { %vm903_vm14 = vmor %vm687_vm7, %vm839_vm4  ;;  %vm3236_vm4 = vnez %v3073_v35 }
 0x185   : > { %v967_v52 = vsel %vm903_vm14, 0.0, %v218_v48  ;;  %vm472_vm3 = vmor %vm2538_vm1, %vm3234_vm12  ;;  %vm3237_vm12 = vnez %v3075_v37  ;;  %v231_v48 = vld [vmem:[%s1580_s9 + $0x1a8] sm:$0xff] }
 0x186   : > { %1031 = vst [vmem:[%s1721_s6 + $0x140] sm:$0xff] %v967_v52  ;;  %vm624_vm15 = vmand %vm2546_vm5, %vm3235_vm10  ;;  %v232_v52 = vld [vmem:[%s1580_s9 + $0x1b0] sm:$0xff] }
 0x187   : > { %vm688_vm6 = vmor %vm472_vm3, %vm624_vm15  ;;  %vm3238_vm15 = vnez %v3077_v39 }
 0x188   : > { %vm840_vm8 = vmand %vm2557_vm13, %vm3209_vm0  ;;  %vm3240_vm0 = vnez %v3081_v43 }
 0x189   : > { %vm904_vm7 = vmor %vm688_vm6, %vm840_vm8 }
 0x18a   : > { %v968_v56 = vsel %vm904_vm7, 0.0, %v219_v54  ;;  %vm473_vm14 = vmor %vm2538_vm1, %vm3236_vm4  ;;  %vm3239_vm7 = vnez %v3079_v41  ;;  %v250_v54 = vadd.s32 56, %v1595_v1 }
 0x18b   : > { %1032 = vst [vmem:[%s1721_s6 + $0x148] sm:$0xff] %v968_v56  ;;  %vm625_vm10 = vmand %vm2546_vm5, %vm3237_vm12 }
 0x18c   : > { %vm689_vm3 = vmor %vm473_vm14, %vm625_vm10  ;;  %vm3241_vm14 = vnez %v3083_v45 }
 0x18d   : > { %vm841_vm6 = vmand %vm2557_vm13, %vm3238_vm15  ;;  %vm3243_vm15 = vnez %v3087_v49 }
 0x18e   : > { %vm905_vm8 = vmor %vm689_vm3, %vm841_vm6 }
 0x18f   : > { %v969_v61 = vsel %vm905_vm8, 0.0, %v220_v58  ;;  %vm474_vm4 = vmor %vm2538_vm1, %vm3239_vm7  ;;  %vm3242_vm8 = vnez %v3085_v47  ;;  %v233_v58 = vld [vmem:[%s1580_s9 + $0x1b8] sm:$0xff] }
 0x190   : > { %1033 = vst [vmem:[%s1721_s6 + $0x150] sm:$0xff] %v969_v61  ;;  %vm626_vm12 = vmand %vm2546_vm5, %vm3240_vm0 }
 0x191   : > { %vm690_vm10 = vmor %vm474_vm4, %vm626_vm12  ;;  %vm3244_vm4 = vnez %v3089_v51 }
 0x192   : > { %vm842_vm3 = vmand %vm2557_vm13, %vm3241_vm14  ;;  %vm3246_vm14 = vnez %v3093_v55 }
 0x193   : > { %vm906_vm6 = vmor %vm690_vm10, %vm842_vm3 }
 0x194   : > { %v970_v2 = vsel %vm906_vm6, 0.0, %v221_v63  ;;  %vm475_vm7 = vmor %vm2538_vm1, %vm3242_vm8  ;;  %vm3245_vm6 = vnez %v3091_v53 }
 0x195   : > { %1034 = vst [vmem:[%s1721_s6 + $0x158] sm:$0xff] %v970_v2  ;;  %vm627_vm0 = vmand %vm2546_vm5, %vm3243_vm15 }
 0x196   : > { %vm691_vm12 = vmor %vm475_vm7, %vm627_vm0  ;;  %vm3247_vm7 = vnez %v3095_v57 }
 0x197   : > { %vm843_vm10 = vmand %vm2557_vm13, %vm3244_vm4  ;;  %vm3249_vm4 = vnez %v3099_v60 }
 0x198   : > { %vm907_vm3 = vmor %vm691_vm12, %vm843_vm10 }
 0x199   : > { %v971_v10 = vsel %vm907_vm3, 0.0, %v222_v8  ;;  %vm476_vm8 = vmor %vm2538_vm1, %vm3245_vm6  ;;  %vm3248_vm3 = vnez %v3097_v59 }
 0x19a   : > { %1035 = vst [vmem:[%s1721_s6 + $0x160] sm:$0xff] %v971_v10  ;;  %vm628_vm15 = vmand %vm2546_vm5, %vm3246_vm14 }
 0x19b   : > { %vm692_vm0 = vmor %vm476_vm8, %vm628_vm15  ;;  %vm3250_vm8 = vnez %v3101_v62 }
 0x19c   : > { %vm844_vm12 = vmand %vm2557_vm13, %vm3247_vm7 }
 0x19d   : > { %vm908_vm10 = vmor %vm692_vm0, %vm844_vm12  ;;  %vm3251_vm12 = vnez %v3108_v0 }
 0x19e   : > { %v972_v14 = vsel %vm908_vm10, 0.0, %v223_v12  ;;  %vm477_vm6 = vmor %vm2538_vm1, %vm3248_vm3  ;;  %vm288_vm3 = vcmp.lt.s32.totalorder %v249_v19, %v1603_v4 }
 0x19f   : > { %1036 = vst [vmem:[%s1721_s6 + $0x168] sm:$0xff] %v972_v14  ;;  %vm629_vm14 = vmand %vm2546_vm5, %vm3249_vm4  ;;  %vm3252_vm4 = vnez %v3112_v6 }
 0x1a0   : > { %vm693_vm15 = vmor %vm477_vm6, %vm629_vm14 }
 0x1a1   : > { %vm845_vm7 = vmand %vm2557_vm13, %vm3250_vm8  ;;  %vm278_vm8 = vcmp.ge.s32.totalorder %v249_v19, %v1599_v3 }
 0x1a2   : > { %vm909_vm0 = vmor %vm693_vm15, %vm845_vm7  ;;  %vm307_vm15 = vcmp.ge.s32.totalorder %v249_v19, %v1605_v5 }
 0x1a3   : > { %v973_v20 = vsel %vm909_vm0, 0.0, %v224_v15  ;;  %vm478_vm10 = vmor %vm2538_vm1, %vm3251_vm12  ;;  %vm317_vm1 = vcmp.lt.s32.totalorder %v249_v19, %v1613_v7 }
 0x1a4   : > { %1037 = vst [vmem:[%s1721_s6 + $0x170] sm:$0xff] %v973_v20  ;;  %vm630_vm14 = vmand %vm2546_vm5, %vm3252_vm4 }
 0x1a5   : > { %vm694_vm6 = vmor %vm478_vm10, %vm630_vm14  ;;  %vm504_vm10 = vcmp.ge.s32.totalorder %v249_v19, %v1634_v11  ;;  %vm514_vm14 = vcmp.lt.s32.totalorder %v249_v19, %v1640_v13 }
 0x1a6   : > { %vm846_vm7 = vmand %vm2557_vm13, %vm3144_vm9 }
 0x1a7   : > { %vm910_vm0 = vmor %vm694_vm6, %vm846_vm7  ;;  %vm3257_vm7 = vnez %v3061_v22  ;;  %v237_v22 = vld [vmem:[%s1580_s9 + $0x1d8] sm:$0xff] }
 0x1a8   : > { %v974_v23 = vsel %vm910_vm0, 0.0, %v225_v21  ;;  %vm296_vm12 = vmand %vm278_vm8, %vm288_vm3  ;;  %vm720_vm3 = vcmp.ge.s32.totalorder %v249_v19, %v1665_v17  ;;  %vm730_vm8 = vcmp.lt.s32.totalorder %v249_v19, %v1667_v18 }
 0x1a9   : > { %1038 = vst [vmem:[%s1721_s6 + $0x178] sm:$0xff] %v974_v23  ;;  %vm325_vm5 = vmand %vm307_vm15, %vm317_vm1 }
 0x1aa   : > { %vm2671_vm4 = vmor %vm296_vm12, %vm325_vm5 }
 0x1ab   : > { %vm479_vm13 = vmor %vm2671_vm4, %vm3119_vm2 }
 0x1ac   : > { %vm2679_vm6 = vmand %vm504_vm10, %vm514_vm14  ;;  %vm3260_vm10 = vnez %v3067_v29 }
 0x1ad   : > { %vm631_vm12 = vmand %vm2679_vm6, %vm3257_vm7 }
 0x1ae   : > { %vm695_vm15 = vmor %vm479_vm13, %vm631_vm12  ;;  %vm3261_vm13 = vnez %v3069_v31  ;;  %vm3262_vm12 = vnez %v3071_v33 }
 0x1af   : > { %vm2690_vm1 = vmand %vm720_vm3, %vm730_vm8 }
 0x1b0   : > { %vm847_vm0 = vmand %vm2690_vm1, %vm3233_vm11  ;;  %vm3264_vm11 = vnez %v3075_v37 }
 0x1b1   : > { %vm911_vm5 = vmor %vm695_vm15, %vm847_vm0 }
 0x1b2   : > { %v975_v30 = vsel %vm911_vm5, 0.0, %v226_v27  ;;  %vm480_vm14 = vmor %vm2671_vm4, %vm3260_vm10  ;;  %vm3263_vm5 = vnez %v3073_v35 }
 0x1b3   : > { %1039 = vst [vmem:[%s1721_s6 + $0x180] sm:$0xff] %v975_v30  ;;  %vm632_vm3 = vmand %vm2679_vm6, %vm3261_vm13 }
 0x1b4   : > { %vm696_vm8 = vmor %vm480_vm14, %vm632_vm3  ;;  %vm3265_vm3 = vnez %v3077_v39 }
 0x1b5   : > { %vm848_vm15 = vmand %vm2690_vm1, %vm3262_vm12  ;;  %vm3267_vm12 = vnez %v3081_v43 }
 0x1b6   : > { %vm912_vm0 = vmor %vm696_vm8, %vm848_vm15 }
 0x1b7   : > { %v976_v34 = vsel %vm912_vm0, 0.0, %v227_v32  ;;  %vm481_vm10 = vmor %vm2671_vm4, %vm3263_vm5  ;;  %vm3266_vm0 = vnez %v3079_v41 }
 0x1b8   : > { %1040 = vst [vmem:[%s1721_s6 + $0x188] sm:$0xff] %v976_v34  ;;  %vm633_vm13 = vmand %vm2679_vm6, %vm3264_vm11 }
 0x1b9   : > { %vm697_vm14 = vmor %vm481_vm10, %vm633_vm13  ;;  %vm3268_vm13 = vnez %v3083_v45 }
 0x1ba   : > { %vm849_vm8 = vmand %vm2690_vm1, %vm3265_vm3  ;;  %vm3270_vm3 = vnez %v3087_v49 }
 0x1bb   : > { %vm913_vm15 = vmor %vm697_vm14, %vm849_vm8 }
 0x1bc   : > { %v977_v38 = vsel %vm913_vm15, 0.0, %v228_v36  ;;  %vm482_vm5 = vmor %vm2671_vm4, %vm3266_vm0  ;;  %vm3269_vm15 = vnez %v3085_v47 }
 0x1bd   : > { %1041 = vst [vmem:[%s1721_s6 + $0x190] sm:$0xff] %v977_v38  ;;  %vm634_vm11 = vmand %vm2679_vm6, %vm3267_vm12 }
 0x1be   : > { %vm698_vm10 = vmor %vm482_vm5, %vm634_vm11  ;;  %vm3271_vm5 = vnez %v3089_v51 }
 0x1bf   : > { %vm850_vm14 = vmand %vm2690_vm1, %vm3268_vm13  ;;  %vm3273_vm13 = vnez %v3093_v55 }
 0x1c0   : > { %vm914_vm8 = vmor %vm698_vm10, %vm850_vm14 }
 0x1c1   : > { %v978_v42 = vsel %vm914_vm8, 0.0, %v229_v40  ;;  %vm483_vm0 = vmor %vm2671_vm4, %vm3269_vm15  ;;  %vm3272_vm8 = vnez %v3091_v53 }
 0x1c2   : > { %1042 = vst [vmem:[%s1721_s6 + $0x198] sm:$0xff] %v978_v42  ;;  %vm635_vm12 = vmand %vm2679_vm6, %vm3270_vm3 }
 0x1c3   : > { %vm699_vm11 = vmor %vm483_vm0, %vm635_vm12  ;;  %vm3274_vm0 = vnez %v3095_v57 }
 0x1c4   : > { %vm851_vm10 = vmand %vm2690_vm1, %vm3271_vm5  ;;  %vm3276_vm5 = vnez %v3099_v60 }
 0x1c5   : > { %vm915_vm14 = vmor %vm699_vm11, %vm851_vm10 }
 0x1c6   : > { %v979_v46 = vsel %vm915_vm14, 0.0, %v230_v44  ;;  %vm484_vm15 = vmor %vm2671_vm4, %vm3272_vm8  ;;  %vm3275_vm14 = vnez %v3097_v59 }
 0x1c7   : > { %1043 = vst [vmem:[%s1721_s6 + $0x1a0] sm:$0xff] %v979_v46  ;;  %vm636_vm3 = vmand %vm2679_vm6, %vm3273_vm13 }
 0x1c8   : > { %vm700_vm12 = vmor %vm484_vm15, %vm636_vm3  ;;  %vm3277_vm15 = vnez %v3101_v62 }
 0x1c9   : > { %vm852_vm11 = vmand %vm2690_vm1, %vm3274_vm0 }
 0x1ca   : > { %vm916_vm10 = vmor %vm700_vm12, %vm852_vm11  ;;  %vm3278_vm11 = vnez %v3108_v0 }
 0x1cb   : > { %v980_v50 = vsel %vm916_vm10, 0.0, %v231_v48  ;;  %vm485_vm8 = vmor %vm2671_vm4, %vm3275_vm14  ;;  %vm289_vm14 = vcmp.lt.s32.totalorder %v250_v54, %v1603_v4 }
 0x1cc   : > { %1044 = vst [vmem:[%s1721_s6 + $0x1a8] sm:$0xff] %v980_v50  ;;  %vm637_vm13 = vmand %vm2679_vm6, %vm3276_vm5  ;;  %vm3279_vm5 = vnez %v3112_v6 }
 0x1cd   : > { %vm701_vm3 = vmor %vm485_vm8, %vm637_vm13 }
 0x1ce   : > { %vm853_vm0 = vmand %vm2690_vm1, %vm3277_vm15  ;;  %vm279_vm15 = vcmp.ge.s32.totalorder %v250_v54, %v1599_v3 }
 0x1cf   : > { %vm917_vm12 = vmor %vm701_vm3, %vm853_vm0  ;;  %vm308_vm3 = vcmp.ge.s32.totalorder %v250_v54, %v1605_v5  ;;  %v234_v5 = vld [vmem:[%s1580_s9 + $0x1c0] sm:$0xff] }
 0x1d0   : > { %v981_v56 = vsel %vm917_vm12, 0.0, %v232_v52  ;;  %vm486_vm10 = vmor %vm2671_vm4, %vm3278_vm11  ;;  %vm318_vm4 = vcmp.lt.s32.totalorder %v250_v54, %v1613_v7 }
 0x1d1   : > { %1045 = vst [vmem:[%s1721_s6 + $0x1b0] sm:$0xff] %v981_v56  ;;  %vm638_vm13 = vmand %vm2679_vm6, %vm3279_vm5 }
 0x1d2   : > { %vm702_vm8 = vmor %vm486_vm10, %vm638_vm13  ;;  %vm505_vm10 = vcmp.ge.s32.totalorder %v250_v54, %v1634_v11  ;;  %vm515_vm13 = vcmp.lt.s32.totalorder %v250_v54, %v1640_v13  ;;  %v235_v13 = vld [vmem:[%s1580_s9 + $0x1c8] sm:$0xff] }
 0x1d3   : > { %vm854_vm0 = vmand %vm2690_vm1, %vm3144_vm9 }
 0x1d4   : > { %vm918_vm12 = vmor %vm702_vm8, %vm854_vm0 }
 0x1d5   : > { %v982_v1 = vsel %vm918_vm12, 0.0, %v233_v58  ;;  %vm297_vm11 = vmand %vm279_vm15, %vm289_vm14  ;;  %vm721_vm14 = vcmp.ge.s32.totalorder %v250_v54, %v1665_v17  ;;  %vm731_vm15 = vcmp.lt.s32.totalorder %v250_v54, %v1667_v18  ;;  %v236_v17 = vld [vmem:[%s1580_s9 + $0x1d0] sm:$0xff] }
 0x1d6   : > { %1046 = vst [vmem:[%s1721_s6 + $0x1b8] sm:$0xff] %v982_v1  ;;  %vm326_vm6 = vmand %vm308_vm3, %vm318_vm4 }
 0x1d7   : > { %vm2804_vm5 = vmor %vm297_vm11, %vm326_vm6  ;;  %vm3287_vm6 = vnez %v3067_v29  ;;  %v238_v29 = vld [vmem:[%s1580_s9 + $0x1e0] sm:$0xff] }
 0x1d8   : > { %vm487_vm1 = vmor %vm2804_vm5, %vm3119_vm2  ;;  %vm3286_vm2 = vnez %v3065_v26 }
 0x1d9   : > { %vm2812_vm8 = vmand %vm505_vm10, %vm515_vm13  ;;  %vm3288_vm10 = vnez %v3069_v31 }
 0x1da   : > { %vm639_vm11 = vmand %vm2812_vm8, %vm3257_vm7 }
 0x1db   : > { %vm703_vm0 = vmor %vm487_vm1, %vm639_vm11 }
 0x1dc   : > { %vm2823_vm3 = vmand %vm721_vm14, %vm731_vm15  ;;  %vm3289_vm14 = vnez %v3071_v33  ;;  %v239_v33 = vld [vmem:[%s1580_s9 + $0x1e8] sm:$0xff] }
 0x1dd   : > { %vm855_vm4 = vmand %vm2823_vm3, %vm3286_vm2 }
 0x1de   : > { %vm919_vm12 = vmor %vm703_vm0, %vm855_vm4  ;;  %vm3290_vm0 = vnez %v3073_v35  ;;  %vm3291_vm4 = vnez %v3075_v37  ;;  %v240_v37 = vld [vmem:[%s1580_s9 + $0x1f0] sm:$0xff] }
 0x1df   : > { %v983_v11 = vsel %vm919_vm12, 0.0, %v234_v5  ;;  %vm488_vm7 = vmor %vm2804_vm5, %vm3287_vm6 }
 0x1e0   : > { %1047 = vst [vmem:[%s1721_s6 + $0x1c0] sm:$0xff] %v983_v11  ;;  %vm640_vm13 = vmand %vm2812_vm8, %vm3288_vm10 }
 0x1e1   : > { %vm704_vm1 = vmor %vm488_vm7, %vm640_vm13  ;;  %vm3292_vm7 = vnez %v3077_v39 }
 0x1e2   : > { %vm856_vm15 = vmand %vm2823_vm3, %vm3289_vm14 }
 0x1e3   : > { %vm920_vm11 = vmor %vm704_vm1, %vm856_vm15  ;;  %vm3293_vm1 = vnez %v3079_v41  ;;  %vm3294_vm15 = vnez %v3081_v43  ;;  %v241_v41 = vld [vmem:[%s1580_s9 + $0x1f8] sm:$0xff]  ;;  %s1324_s9 = scalar_lea.vmem %s2936_s7, 8192 }
 0x1e4   : > { %v984_v16 = vsel %vm920_vm11, 0.0, %v235_v13  ;;  %vm489_vm2 = vmor %vm2804_vm5, %vm3290_vm0  ;;  %p1325_p0 = scmp.ne.s32.totalorder %s2936_s7, %s1324_s9  ;;  %p1332_p5 = scmp.lt.s32.totalorder %s1330_s20, %s1324_s9 }
 0x1e5   : > { %1048 = vst [vmem:[%s1721_s6 + $0x1c8] sm:$0xff] %v984_v16  ;;  %vm641_vm12 = vmand %vm2812_vm8, %vm3291_vm4 }
 0x1e6   : > { %vm705_vm6 = vmor %vm489_vm2, %vm641_vm12  ;;  %vm3295_vm2 = vnez %v3083_v45  ;;  %p1326_p3 = pnand %p1325_p0, %p3307_p1  ;;  %p1333_p8 = por %p1332_p5, %p1331_p12 }
 0x1e7   : > { %vm857_vm10 = vmand %vm2823_vm3, %vm3292_vm7 }
 0x1e8   : > { %vm921_vm13 = vmor %vm705_vm6, %vm857_vm10  ;;  %vm3296_vm6 = vnez %v3085_v47  ;;  %vm3297_vm10 = vnez %v3087_v49  ;;  %p1327_p6 = pneg %p1326_p3 }
 0x1e9   : > { %v985_v18 = vsel %vm921_vm13, 0.0, %v236_v17  ;;  %vm490_vm14 = vmor %vm2804_vm5, %vm3293_vm1 }
 0x1ea   : > { %1049 = vst [vmem:[%s1721_s6 + $0x1d0] sm:$0xff] %v985_v18  ;;  %vm642_vm11 = vmand %vm2812_vm8, %vm3294_vm15  ;;  %p1334_p11 = pnand %p1333_p8, %p1327_p6 }
 0x1eb   : > { %vm706_vm0 = vmor %vm490_vm14, %vm642_vm11  ;;  %vm3298_vm14 = vnez %v3089_v51 }
 0x1ec   : > { %vm858_vm4 = vmand %vm2823_vm3, %vm3295_vm2 }
 0x1ed   : > { %vm922_vm12 = vmor %vm706_vm0, %vm858_vm4  ;;  %vm3299_vm0 = vnez %v3091_v53  ;;  %vm3300_vm4 = vnez %v3093_v55 }
 0x1ee   : > { %v986_v26 = vsel %vm922_vm12, 0.0, %v237_v22  ;;  %vm491_vm7 = vmor %vm2804_vm5, %vm3296_vm6 }
 0x1ef   : > { %1050 = vst [vmem:[%s1721_s6 + $0x1d8] sm:$0xff] %v986_v26  ;;  %vm643_vm13 = vmand %vm2812_vm8, %vm3297_vm10 }
 0x1f0   : > { %vm707_vm1 = vmor %vm491_vm7, %vm643_vm13  ;;  %vm3301_vm7 = vnez %v3095_v57 }
 0x1f1   : > { %vm859_vm15 = vmand %vm2823_vm3, %vm3298_vm14 }
 0x1f2   : > { %vm923_vm11 = vmor %vm707_vm1, %vm859_vm15  ;;  %vm3302_vm1 = vnez %v3097_v59  ;;  %vm3303_vm15 = vnez %v3099_v60 }
 0x1f3   : > { %v987_v31 = vsel %vm923_vm11, 0.0, %v238_v29  ;;  %vm492_vm2 = vmor %vm2804_vm5, %vm3299_vm0 }
 0x1f4   : > { %1051 = vst [vmem:[%s1721_s6 + $0x1e0] sm:$0xff] %v987_v31  ;;  %vm644_vm12 = vmand %vm2812_vm8, %vm3300_vm4 }
 0x1f5   : > { %vm708_vm6 = vmor %vm492_vm2, %vm644_vm12  ;;  %vm3304_vm2 = vnez %v3101_v62 }
 0x1f6   : > { %vm860_vm10 = vmand %vm2823_vm3, %vm3301_vm7 }
 0x1f7   : > { %vm924_vm13 = vmor %vm708_vm6, %vm860_vm10  ;;  %vm3305_vm6 = vnez %v3108_v0  ;;  %vm3306_vm10 = vnez %v3112_v6 }
 0x1f8   : > { %v988_v35 = vsel %vm924_vm13, 0.0, %v239_v33  ;;  %vm493_vm14 = vmor %vm2804_vm5, %vm3302_vm1 }
 0x1f9   : > { %1052 = vst [vmem:[%s1721_s6 + $0x1e8] sm:$0xff] %v988_v35  ;;  %vm645_vm11 = vmand %vm2812_vm8, %vm3303_vm15 }
 0x1fa   : > { %vm709_vm0 = vmor %vm493_vm14, %vm645_vm11 }
 0x1fb   : > { %vm861_vm4 = vmand %vm2823_vm3, %vm3304_vm2 }
 0x1fc   : > { %vm925_vm12 = vmor %vm709_vm0, %vm861_vm4 }
 0x1fd   : > { %v989_v39 = vsel %vm925_vm12, 0.0, %v240_v37  ;;  %vm494_vm7 = vmor %vm2804_vm5, %vm3305_vm6 }
 0x1fe   : > { %1053 = vst [vmem:[%s1721_s6 + $0x1f0] sm:$0xff] %v989_v39  ;;  %vm646_vm13 = vmand %vm2812_vm8, %vm3306_vm10 }
 0x1ff   : > { %vm710_vm1 = vmor %vm494_vm7, %vm646_vm13 }
 0x200   : > { %vm862_vm14 = vmand %vm2823_vm3, %vm3144_vm9 }
 0x201   : > { %vm926_vm5 = vmor %vm710_vm1, %vm862_vm14 }
 0x202   : > { %v990_v43 = vsel %vm926_vm5, 0.0, %v241_v41 }
 0x203   : > { %1054 = vst [vmem:[%s1721_s6 + $0x1f8] sm:$0xff] %v990_v43 }
 0x204   : > { %1337 = shalt.err (!%p1334_p11)
}
 0x205   : > { %s1338_s21 = scalar_lea.hbm %s2934_s16, 8192  ;;  %s1342_s0 = scalar_lea.hbm %s2988_s5, 16384 }
 0x206   : > { %p1339_p10 = scmp.ne.s32.totalorder %s2934_s16, %s1338_s21  ;;  %p1343_p4 = scmp.lt.u32.totalorder %s2934_s16, %s2988_s5 }
 0x207   : > { %p1344_p7 = scmp.lt.u32.totalorder %s1342_s0, %s1338_s21  ;;  %p1346_p0 = scmp.lt.u32.totalorder %s1338_s21, %s2934_s16 }
 0x208   : > { %p1340_p13 = pnand %p1339_p10, %p3307_p1 }
 0x209   : > { %p1345_p9 = por %p1344_p7, %p1343_p4 }
 0x20a   : > { %p1341_p2 = pneg %p1340_p13 }
 0x20b   : > { %p1347_p3 = por %p1346_p0, %p1345_p9 }
 0x20d   : > { %p1348_p6 = pnand %p1347_p3, %p1341_p2 }
 0x20f   : > { %1351 = shalt.err (!%p1348_p6)
}
 0x210   : > { %s1418_s28 = smov 1024   ;;  %s1419_s30 = smov 64  }
 0x211   : > { %1178 = dma.vmem_to_hbm [thread:$0]  (%p3307_p1), %s2936_s7, 8192, %s2934_s16, %s1056_s12, %s1418_s28, %s1418_s28, %s1419_s30  }
 0x212 PF: > { %s1086_s6 = sand.u32 1, %s1388_s3   ;;  %p3308_p12 = scmp.ne.s32.totalorder %s3051_s24, 0 }
 0x213   : > { %p3309_p5 = scmp.ge.s32.totalorder %s1408_s14, 2  ;;  %s1087_s29 = scalar_lea.sflag [#allocation9], %s1086_s6 }
 0x215   : > { %p1185_p8 = pnand %p3309_p5, %p3308_p12 }
 0x217   : > { %1383 = dma.done.wait (!%p1185_p8), %s1087_s29, 8192  }
 0x218   : > { %1385 = vsyncadd (!%p1185_p8), %s1087_s29, 4294959104  ;;  %s39_s14 = sadd.s32 1, %s1408_s14   ;;  %s3310_s3 = smov %s1392_s10 }
 0x219   : > { %p36_p11 = scmp.ge.s32.totalorder %s39_s14, 4   ;;  %s3311_s10 = smov %s1396_s11 }
 0x21a   : > { %s3312_s11 = smov %s1518_s23  ;;  %s3313_s12 = smov %s1404_s13 }
 0x21b   : > { %s3314_s13 = smov %s3316_s17  ;;  %38 = sbr.rel (!%p36_p11) target bundleno = 52 (0x34), region = 69 }
 0x222   :  { %1092 = vsyncpa [#allocation8], 1 }
 0x223   :  { %1094 = vsyncpa [#allocation8 + $0x1], 1 }
 0x224   :  { %1095 = vsyncpa [#allocation9], 1 }
 0x225   :  { %1097 = vsyncpa [#allocation9 + $0x1], 1 }

</bundles_post_ra>
